<compile_context>
chip_gen: v7x
topology: tpu7x:2x2x1
jax: 0.10.0
libtpu: 0.0.40
codegen_flags: <defaults>
</compile_context>

<pallas_src>
import jax
import jax.numpy as jnp
from jax.experimental import pallas as pl
from jax.experimental.pallas import tpu as pltpu


def mlp_kernel(x_ref,
               w1_ref, b1_ref,
               w2_ref, b2_ref,
               w3_ref, b3_ref,
               w4_ref, b4_ref,
               o_ref):
    """Transposed MLP: x_ref [5, T], w* [out, in], b* [out, 1], o_ref [2, T]."""
    cd = w1_ref.dtype  # MXU operand dtype (bfloat16 by default)

    # fc1 + bias + ReLU   ([64,5] @ [5,T] -> [64,T], f32 accumulate)
    h = jnp.dot(w1_ref[...], x_ref[...], preferred_element_type=jnp.float32)
    h = jnp.maximum(h + b1_ref[...], 0.0)
    # (dropout p=0.05: identity in eval mode)

    # fc2 + bias + ReLU
    h = jnp.dot(w2_ref[...], h.astype(cd), preferred_element_type=jnp.float32)
    h = jnp.maximum(h + b2_ref[...], 0.0)

    # fc3 + bias + ReLU
    h = jnp.dot(w3_ref[...], h.astype(cd), preferred_element_type=jnp.float32)
    h = jnp.maximum(h + b3_ref[...], 0.0)

    # fc4 (no activation). M=2 is a near-empty MXU pass, but the MXU has plenty of
    # slack here and the [2, T] result store stays lane-dense.
    out = jnp.dot(w4_ref[...], h.astype(cd), preferred_element_type=jnp.float32)
    o_ref[...] = (out + b4_ref[...]).astype(o_ref.dtype)


def rgb2normnet_forward(x, params, *, tile_n=1024, compute_dtype=jnp.bfloat16):
    """x: [N, 5] f32; params: PyTorch-style weights [out, in] / biases [out]. Returns [N, 2] f32."""
    N, F = x.shape
    assert F == 5
    assert tile_n % 128 == 0, "tile_n must be a multiple of 128 (lane width)"

    n_tiles = pl.cdiv(N, tile_n)
    n_pad = n_tiles * tile_n

    x_p = x if n_pad == N else jnp.pad(x, ((0, n_pad - N), (0, 0)))
    xt = x_p.T.astype(compute_dtype)                          # [5, n_pad]: batch on lanes

    def wb(wname, bname):
        w = params[wname].astype(compute_dtype)               # [out, in]
        b = params[bname].reshape(-1, 1).astype(jnp.float32)  # [out, 1] (lane-broadcast)
        return w, b

    w1, b1 = wb("w1", "b1")
    w2, b2 = wb("w2", "b2")
    w3, b3 = wb("w3", "b3")
    w4, b4 = wb("w4", "b4")

    def rep_spec(arr):
        # Full-array block with a constant index_map: logically resident across steps.
        nd = arr.ndim
        return pl.BlockSpec(arr.shape, lambda i: (0,) * nd)

    flops = 2 * n_pad * (5 * 64 + 64 * 64 + 64 * 64 + 64 * 2)
    param_bytes = sum(int(a.size) * a.dtype.itemsize
                      for a in (w1, b1, w2, b2, w3, b3, w4, b4))
    bytes_accessed = int(xt.size) * xt.dtype.itemsize + n_pad * 2 * 4 + param_bytes

    out_t = pl.pallas_call(
        mlp_kernel,
        out_shape=jax.ShapeDtypeStruct((2, n_pad), jnp.float32),
        grid_spec=pltpu.PrefetchScalarGridSpec(
            num_scalar_prefetch=0,
            grid=(n_tiles,),
            in_specs=[
                pl.BlockSpec((5, tile_n), lambda i: (0, i)),  # x tile, lane-dense batch
                rep_spec(w1), rep_spec(b1),
                rep_spec(w2), rep_spec(b2),
                rep_spec(w3), rep_spec(b3),
                rep_spec(w4), rep_spec(b4),
            ],
            out_specs=pl.BlockSpec((2, tile_n), lambda i: (0, i)),
        ),
        compiler_params=pltpu.CompilerParams(
            dimension_semantics=("parallel",),
            vmem_limit_bytes=32 * 1024 * 1024,
        ),
        cost_estimate=pl.CostEstimate(
            flops=flops, transcendentals=0, bytes_accessed=bytes_accessed),
    )(xt, w1, b1, w2, b2, w3, b3, w4, b4)

    return out_t[:, :N].T                                     # [N, 2] float32


def init_params(key):
    """nn.Linear-style init: weight [out, in], bias [out], uniform(+-1/sqrt(fan_in))."""
    ks = jax.random.split(key, 8)

    def linear(kw, kb, fan_in, fan_out):
        bound = 1.0 / (fan_in ** 0.5)
        w = jax.random.uniform(kw, (fan_out, fan_in), jnp.float32, -bound, bound)
        b = jax.random.uniform(kb, (fan_out,), jnp.float32, -bound, bound)
        return w, b

    w1, b1 = linear(ks[0], ks[1], 5, 64)
    w2, b2 = linear(ks[2], ks[3], 64, 64)
    w3, b3 = linear(ks[4], ks[5], 64, 64)
    w4, b4 = linear(ks[6], ks[7], 64, 2)
    return dict(w1=w1, b1=b1, w2=w2, b2=b2, w3=w3, b3=b3, w4=w4, b4=b4)


def reference_forward_f32(x, p):
    h = jnp.maximum(x @ p["w1"].T + p["b1"], 0.0)
    h = jnp.maximum(h @ p["w2"].T + p["b2"], 0.0)
    h = jnp.maximum(h @ p["w3"].T + p["b3"], 0.0)
    return h @ p["w4"].T + p["b4"]


def reference_forward_quant(x, p, compute_dtype=jnp.bfloat16):
    """Mirrors the kernel arithmetic: bf16 MXU operands, f32 accumulate + epilogue."""
    cd = compute_dtype

    def layer(h, w, b, relu):
        y = jnp.dot(h.astype(cd), w.T.astype(cd),
                    preferred_element_type=jnp.float32) + b
        return jnp.maximum(y, 0.0) if relu else y

    h = layer(x, p["w1"], p["b1"], True)
    h = layer(h, p["w2"], p["b2"], True)
    h = layer(h, p["w3"], p["b3"], True)
    return layer(h, p["w4"], p["b4"], False)


if __name__ == "__main__":
    key = jax.random.PRNGKey(0)
    k_x, k_p = jax.random.split(key)

    N = 200  # small demo batch, deliberately not a multiple of the tile (exercises padding)
    x = jax.random.normal(k_x, (N, 5), jnp.float32)
    params = init_params(k_p)

    out = rgb2normnet_forward(x, params)
    out = jax.block_until_ready(out)
    assert out.shape == (N, 2)

    # Tight check against a reference doing the same bf16-operand / f32-accumulate math.
    ref_q = reference_forward_quant(x, params)
    assert jnp.allclose(out, ref_q, atol=2e-3, rtol=2e-3), "mismatch vs bf16 reference"

    # Loose sanity check against the pure-f32 PyTorch-equivalent forward.
    ref_f32 = reference_forward_f32(x, params)
    assert jnp.allclose(out, ref_f32, atol=1e-1, rtol=1e-1), "mismatch vs f32 reference"

    print("KERNEL_OK")
</pallas_src>

<mosaic_0001>
module attributes {stable_mosaic.version = 11 : i64} {
  func.func @mlp_kernel(%arg0: i32, %arg1: memref<5x1024xbf16, #tpu.memory_space<vmem>>, %arg2: memref<64x5xbf16, #tpu.memory_space<vmem>>, %arg3: memref<64x1xf32, #tpu.memory_space<vmem>>, %arg4: memref<64x64xbf16, #tpu.memory_space<vmem>>, %arg5: memref<64x1xf32, #tpu.memory_space<vmem>>, %arg6: memref<64x64xbf16, #tpu.memory_space<vmem>>, %arg7: memref<64x1xf32, #tpu.memory_space<vmem>>, %arg8: memref<2x64xbf16, #tpu.memory_space<vmem>>, %arg9: memref<2x1xf32, #tpu.memory_space<vmem>>, %arg10: memref<2x1024xf32, #tpu.memory_space<vmem>>) attributes {dimension_semantics = [#tpu.dimension_semantics<parallel>], iteration_bounds = array<i64: 1>, scalar_prefetch = 0 : i64, scratch_operands = 0 : i64, tpu.core_type = #tpu.core_type<tc>, window_params = [{transform_indices = @transform_0, window_bounds = array<i64: 5, 1024>}, {pipeline_mode = #tpu.pipeline_mode<synchronous>, transform_indices = @transform_1, window_bounds = array<i64: 64, 5>}, {pipeline_mode = #tpu.pipeline_mode<synchronous>, transform_indices = @transform_2, window_bounds = array<i64: 64, 1>}, {pipeline_mode = #tpu.pipeline_mode<synchronous>, transform_indices = @transform_3, window_bounds = array<i64: 64, 64>}, {pipeline_mode = #tpu.pipeline_mode<synchronous>, transform_indices = @transform_4, window_bounds = array<i64: 64, 1>}, {pipeline_mode = #tpu.pipeline_mode<synchronous>, transform_indices = @transform_5, window_bounds = array<i64: 64, 64>}, {pipeline_mode = #tpu.pipeline_mode<synchronous>, transform_indices = @transform_6, window_bounds = array<i64: 64, 1>}, {pipeline_mode = #tpu.pipeline_mode<synchronous>, transform_indices = @transform_7, window_bounds = array<i64: 2, 64>}, {pipeline_mode = #tpu.pipeline_mode<synchronous>, transform_indices = @transform_8, window_bounds = array<i64: 2, 1>}, {transform_indices = @transform_9, window_bounds = array<i64: 2, 1024>}]} {
    %c0 = arith.constant 0 : index
    %c0_0 = arith.constant 0 : index
    %0 = vector.load %arg2[%c0, %c0_0] : memref<64x5xbf16, #tpu.memory_space<vmem>>, vector<64x5xbf16>
    %c0_1 = arith.constant 0 : index
    %c0_2 = arith.constant 0 : index
    %1 = vector.load %arg1[%c0_1, %c0_2] : memref<5x1024xbf16, #tpu.memory_space<vmem>>, vector<5x1024xbf16>
    %cst = arith.constant dense<0.000000e+00> : vector<64x1024xf32>
    %2 = tpu.matmul %0, %1, %cst {dimension_numbers = #tpu.dot_dimension_numbers<[1], [0], [0], [1], [0, 0, 1, 1], [], []>} : vector<64x5xbf16>, vector<5x1024xbf16>, vector<64x1024xf32> -> vector<64x1024xf32>
    %c0_3 = arith.constant 0 : index
    %c0_4 = arith.constant 0 : index
    %3 = vector.load %arg3[%c0_3, %c0_4] : memref<64x1xf32, #tpu.memory_space<vmem>>, vector<64x1xf32>
    %4 = vector.broadcast %3 : vector<64x1xf32> to vector<64x1024xf32>
    %5 = arith.addf %2, %4 : vector<64x1024xf32>
    %cst_5 = arith.constant 0.000000e+00 : f32
    %6 = vector.broadcast %cst_5 : f32 to vector<64x1024xf32>
    %7 = arith.maximumf %5, %6 : vector<64x1024xf32>
    %c0_6 = arith.constant 0 : index
    %c0_7 = arith.constant 0 : index
    %8 = vector.load %arg4[%c0_6, %c0_7] : memref<64x64xbf16, #tpu.memory_space<vmem>>, vector<64x64xbf16>
    %9 = arith.truncf %7 : vector<64x1024xf32> to vector<64x1024xbf16>
    %cst_8 = arith.constant dense<0.000000e+00> : vector<64x1024xf32>
    %10 = tpu.matmul %8, %9, %cst_8 {dimension_numbers = #tpu.dot_dimension_numbers<[1], [0], [0], [1], [0, 0, 1, 1], [], []>} : vector<64x64xbf16>, vector<64x1024xbf16>, vector<64x1024xf32> -> vector<64x1024xf32>
    %c0_9 = arith.constant 0 : index
    %c0_10 = arith.constant 0 : index
    %11 = vector.load %arg5[%c0_9, %c0_10] : memref<64x1xf32, #tpu.memory_space<vmem>>, vector<64x1xf32>
    %12 = vector.broadcast %11 : vector<64x1xf32> to vector<64x1024xf32>
    %13 = arith.addf %10, %12 : vector<64x1024xf32>
    %cst_11 = arith.constant 0.000000e+00 : f32
    %14 = vector.broadcast %cst_11 : f32 to vector<64x1024xf32>
    %15 = arith.maximumf %13, %14 : vector<64x1024xf32>
    %c0_12 = arith.constant 0 : index
    %c0_13 = arith.constant 0 : index
    %16 = vector.load %arg6[%c0_12, %c0_13] : memref<64x64xbf16, #tpu.memory_space<vmem>>, vector<64x64xbf16>
    %17 = arith.truncf %15 : vector<64x1024xf32> to vector<64x1024xbf16>
    %cst_14 = arith.constant dense<0.000000e+00> : vector<64x1024xf32>
    %18 = tpu.matmul %16, %17, %cst_14 {dimension_numbers = #tpu.dot_dimension_numbers<[1], [0], [0], [1], [0, 0, 1, 1], [], []>} : vector<64x64xbf16>, vector<64x1024xbf16>, vector<64x1024xf32> -> vector<64x1024xf32>
    %c0_15 = arith.constant 0 : index
    %c0_16 = arith.constant 0 : index
    %19 = vector.load %arg7[%c0_15, %c0_16] : memref<64x1xf32, #tpu.memory_space<vmem>>, vector<64x1xf32>
    %20 = vector.broadcast %19 : vector<64x1xf32> to vector<64x1024xf32>
    %21 = arith.addf %18, %20 : vector<64x1024xf32>
    %cst_17 = arith.constant 0.000000e+00 : f32
    %22 = vector.broadcast %cst_17 : f32 to vector<64x1024xf32>
    %23 = arith.maximumf %21, %22 : vector<64x1024xf32>
    %c0_18 = arith.constant 0 : index
    %c0_19 = arith.constant 0 : index
    %24 = vector.load %arg8[%c0_18, %c0_19] : memref<2x64xbf16, #tpu.memory_space<vmem>>, vector<2x64xbf16>
    %25 = arith.truncf %23 : vector<64x1024xf32> to vector<64x1024xbf16>
    %cst_20 = arith.constant dense<0.000000e+00> : vector<2x1024xf32>
    %26 = tpu.matmul %24, %25, %cst_20 {dimension_numbers = #tpu.dot_dimension_numbers<[1], [0], [0], [1], [0, 0, 1, 1], [], []>} : vector<2x64xbf16>, vector<64x1024xbf16>, vector<2x1024xf32> -> vector<2x1024xf32>
    %c0_21 = arith.constant 0 : index
    %c0_22 = arith.constant 0 : index
    %27 = vector.load %arg9[%c0_21, %c0_22] : memref<2x1xf32, #tpu.memory_space<vmem>>, vector<2x1xf32>
    %28 = vector.broadcast %27 : vector<2x1xf32> to vector<2x1024xf32>
    %29 = arith.addf %26, %28 : vector<2x1024xf32>
    %c0_23 = arith.constant 0 : index
    %c0_24 = arith.constant 0 : index
    %30 = vector.load %arg10[%c0_23, %c0_24] : memref<2x1024xf32, #tpu.memory_space<vmem>>, vector<2x1024xf32>
    tpu.vector_store %arg10[%c0_23, %c0_24], %29 {strides = array<i32>} : memref<2x1024xf32, #tpu.memory_space<vmem>>, vector<2x1024xf32>,
    return
  }
  func.func @transform_0(%arg0: i32) -> (i32, i32) {
    %c0_i32 = arith.constant 0 : i32
    %c0_i32_0 = arith.constant 0 : i32
    return %c0_i32, %arg0 : i32, i32
  }
  func.func @transform_1(%arg0: i32) -> (i32, i32) {
    %c0_i32 = arith.constant 0 : i32
    %c0_i32_0 = arith.constant 0 : i32
    %c0_i32_1 = arith.constant 0 : i32
    return %c0_i32, %c0_i32_0 : i32, i32
  }
  func.func @transform_2(%arg0: i32) -> (i32, i32) {
    %c0_i32 = arith.constant 0 : i32
    %c0_i32_0 = arith.constant 0 : i32
    %c0_i32_1 = arith.constant 0 : i32
    return %c0_i32, %c0_i32_0 : i32, i32
  }
  func.func @transform_3(%arg0: i32) -> (i32, i32) {
    %c0_i32 = arith.constant 0 : i32
    %c0_i32_0 = arith.constant 0 : i32
    %c0_i32_1 = arith.constant 0 : i32
    return %c0_i32, %c0_i32_0 : i32, i32
  }
  func.func @transform_4(%arg0: i32) -> (i32, i32) {
    %c0_i32 = arith.constant 0 : i32
    %c0_i32_0 = arith.constant 0 : i32
    %c0_i32_1 = arith.constant 0 : i32
    return %c0_i32, %c0_i32_0 : i32, i32
  }
  func.func @transform_5(%arg0: i32) -> (i32, i32) {
    %c0_i32 = arith.constant 0 : i32
    %c0_i32_0 = arith.constant 0 : i32
    %c0_i32_1 = arith.constant 0 : i32
    return %c0_i32, %c0_i32_0 : i32, i32
  }
  func.func @transform_6(%arg0: i32) -> (i32, i32) {
    %c0_i32 = arith.constant 0 : i32
    %c0_i32_0 = arith.constant 0 : i32
    %c0_i32_1 = arith.constant 0 : i32
    return %c0_i32, %c0_i32_0 : i32, i32
  }
  func.func @transform_7(%arg0: i32) -> (i32, i32) {
    %c0_i32 = arith.constant 0 : i32
    %c0_i32_0 = arith.constant 0 : i32
    %c0_i32_1 = arith.constant 0 : i32
    return %c0_i32, %c0_i32_0 : i32, i32
  }
  func.func @transform_8(%arg0: i32) -> (i32, i32) {
    %c0_i32 = arith.constant 0 : i32
    %c0_i32_0 = arith.constant 0 : i32
    %c0_i32_1 = arith.constant 0 : i32
    return %c0_i32, %c0_i32_0 : i32, i32
  }
  func.func @transform_9(%arg0: i32) -> (i32, i32) {
    %c0_i32 = arith.constant 0 : i32
    %c0_i32_0 = arith.constant 0 : i32
    return %c0_i32, %arg0 : i32, i32
  }
}

</mosaic_0001>

<bundles_post_ra>
// kernel: tpu_custom_call.1
= control target key start
LH: loop header
LB: loop body
LE: loop exit
PB: predicated region body
PF: predicated region fallthrough
CT: control target
= control target key end

     0   :  { %vm147_vm0 = vcmask 1041408   ;;  %vm148_vm1 = vcmask 1042432   ;;  %v1872_v2 = vmov 65535   ;;  %v1873_v6 = vmov 0   ;;  %s2458_s0 = inlined_call_operand.vmem [shape: bf16[5,1024], index: 0, kind: input, shape index: {}]   ;;  %s2459_s1 = inlined_call_operand.vmem [shape: bf16[64,5], index: 1, kind: input, shape index: {}]   ;;  %s2460_s2 = inlined_call_operand.vmem [shape: f32[64,1], index: 2, kind: input, shape index: {}]   ;;  %s2461_s3 = inlined_call_operand.vmem [shape: bf16[64,64], index: 3, kind: input, shape index: {}]   ;;  %s2462_s4 = inlined_call_operand.vmem [shape: f32[64,1], index: 4, kind: input, shape index: {}]   ;;  %s2463_s5 = inlined_call_operand.vmem [shape: bf16[64,64], index: 5, kind: input, shape index: {}]   ;;  %s2464_s6 = inlined_call_operand.vmem [shape: f32[64,1], index: 6, kind: input, shape index: {}]   ;;  %s2465_s7 = inlined_call_operand.vmem [shape: bf16[2,64], index: 7, kind: input, shape index: {}]   ;;  %s2466_s8 = inlined_call_operand.vmem [shape: f32[2,1], index: 8, kind: input, shape index: {}]   ;;  %s2467_s9 = inlined_call_operand.hbm [shape: f32[2,1024], index: 9, kind: output, shape index: {}]  }
   0x1   :  { %v42_v0 = vld [vmem:[%s2458_s0] sm:$0x77]  ;;  %v149_v3 = vsel %vm147_vm0, 4294967295, %v1872_v2  ;;  %v43_v4 = vld [vmem:[%s2458_s0 + $0x8] sm:$0x77]  ;;  %207 = vmatprep.mubr.bf16.mxu0 %v1873_v6  ;;  %280 = vmatprep.mubr.bf16.mxu1 %v1873_v6  ;;  %vm134_vm2 = vcmask 39936  }
   0x2   :  { %v1755_v1 = vcombine.high %v42_v0, %v42_v0  ;;  %v1754_v5 = vcombine.low %v42_v0, %v42_v0  ;;  %v150_v7 = vsel %vm148_vm1, %v149_v3, 0  ;;  %v1757_v8 = vcombine.high %v43_v4, %v43_v4  ;;  %v44_v10 = vld [vmem:[%s2458_s0 + $0x10] sm:$0x77]  ;;  %1826 = vset.pattern.permute.xlu0 %v1873_v6  ;;  %1827 = vset.pattern.permute.xlu1 %v1873_v6  ;;  %v45_v15 = vld [vmem:[%s2458_s0 + $0x18] sm:$0x77]  ;;  %v1945_v20 = vld [vmem:[%s2459_s1] sm:$0xff]  }
   0x3   :  { %v1756_v9 = vcombine.low %v43_v4, %v43_v4  ;;  %v1758_v13 = vcombine.low %v44_v10, %v44_v10  ;;  %v1759_v14 = vcombine.high %v44_v10, %v44_v10  ;;  %v1760_v18 = vcombine.low %v45_v15, %v45_v15  ;;  %v46_v24 = vld [vmem:[%s2460_s2] sm:$0xff]  ;;  %v48_v26 = vld [vmem:[%s2460_s2 + $0x10] sm:$0xff]  ;;  %v47_v27 = vld [vmem:[%s2460_s2 + $0x8] sm:$0xff] }
   0x4   :  { %v155_v11 = vand.u32 %v1755_v1, %v150_v7  ;;  %v152_v12 = vand.u32 %v1754_v5, %v150_v7  ;;  %v161_v16 = vand.u32 %v1757_v8, %v150_v7  ;;  %v1761_v19 = vcombine.high %v45_v15, %v45_v15  ;;  %56 = vperm.xlu0 %1826, %v46_v24   ;;  %v49_v28 = vld [vmem:[%s2460_s2 + $0x18] sm:$0xff]  ;;  %v1837_v29 = vld [vmem:[%s2459_s1 + $0x8] sm:$0xff]   ;;  %v50_v30 = vld [vmem:[%s2460_s2 + $0x20] sm:$0xff] }
   0x5   :  { %v158_v17 = vand.u32 %v1756_v9, %v150_v7  ;;  %v167_v21 = vand.u32 %v1759_v14, %v150_v7  ;;  %v164_v23 = vand.u32 %v1758_v13, %v150_v7  ;;  %v170_v25 = vand.u32 %v1760_v18, %v150_v7  ;;  %66 = vperm.xlu1 %1827, %v48_v26   ;;  %v51_v31 = vld [vmem:[%s2460_s2 + $0x28] sm:$0xff]  ;;  %v52_v32 = vld [vmem:[%s2460_s2 + $0x30] sm:$0xff]  ;;  %v53_v33 = vld [vmem:[%s2460_s2 + $0x38] sm:$0xff] }
   0x6   :  { %175 = vmatprep.subr.bf16.mxu0 %v155_v11  ;;  %248 = vmatprep.subr.bf16.mxu1 %v161_v16  ;;  %v173_v22 = vand.u32 %v1761_v19, %v150_v7 }
   0x7   :  { %176 = vmatpush1.bf16.msra.mxu0 %v152_v12  ;;  %249 = vmatpush1.bf16.msra.mxu1 %v158_v17 }
   0x8   :  { %321 = vmatprep.subr.bf16.mxu0 %v167_v21  ;;  %394 = vmatprep.subr.bf16.mxu1 %v173_v22 }
   0x9   :  { %61 = vperm.xlu0 %1826, %v47_v27   ;;  %71 = vperm.xlu1 %1827, %v49_v28  }
   0xa   :  { %1762 = vmatmul.mubr.msk.bf16.vlgmr.msra.gmra.mrb[0].mxu0 %vm134_vm2, %v1945_v20  ;;  %1766 = vmatmul.mubr.msk.bf16.vlgmr.msra.gmra.mrb[0].mxu1 %vm134_vm2, %v1945_v20 }
   0xb   :  { %322 = vmatpush1.bf16.msra.mxu0 %v164_v23  ;;  %395 = vmatpush1.bf16.msra.mxu1 %v170_v25 }
   0xc   :  { %217 = vmatprep.mubr.bf16.mxu0 %v1873_v6  ;;  %290 = vmatprep.mubr.bf16.mxu1 %v1873_v6 }
   0xd   :  { %76 = vperm.xlu0 %1826, %v50_v30   ;;  %81 = vperm.xlu1 %1827, %v51_v31  }
  0x11   :  { %86 = vperm.xlu0 %1826, %v52_v32  }
  0x12   :  { %1763 = vmatmul.mubr.msk.bf16.gmra.mrb[4].mxu0 %vm134_vm2, %v1837_v29  ;;  %1767 = vmatmul.mubr.msk.bf16.gmra.mrb[4].mxu1 %vm134_vm2, %v1837_v29 }
  0x13   :  { %227 = vmatprep.mubr.bf16.mxu0 %v1873_v6  ;;  %300 = vmatprep.mubr.bf16.mxu1 %v1873_v6 }
  0x14   :  { %14 = vsyncpa [#allocation3], 0  ;;  %v1838_v34 = vld [vmem:[%s2459_s1 + $0x10] sm:$0xff]   ;;  %v571_v35 = vld [vmem:[%s2462_s4] sm:$0xff]  ;;  %91 = vperm.xlu1 %1827, %v53_v33   ;;  %vm639_vm3 = vcmask 523264  }
  0x15   :  { %v572_v36 = vld [vmem:[%s2462_s4 + $0x8] sm:$0xff]  ;;  %581 = vperm.xlu0 %1826, %v571_v35   ;;  %v573_v37 = vld [vmem:[%s2462_s4 + $0x10] sm:$0xff]  ;;  %v574_v38 = vld [vmem:[%s2462_s4 + $0x18] sm:$0xff] }
  0x16   :  { %v1839_v39 = vld [vmem:[%s2459_s1 + $0x18] sm:$0xff]   ;;  %v575_v40 = vld [vmem:[%s2462_s4 + $0x20] sm:$0xff]  ;;  %v576_v41 = vld [vmem:[%s2462_s4 + $0x28] sm:$0xff] }
  0x17   :  { %v577_v42 = vld [vmem:[%s2462_s4 + $0x30] sm:$0xff]  ;;  %v578_v43 = vld [vmem:[%s2462_s4 + $0x38] sm:$0xff]  ;;  %v1048_v44 = vld [vmem:[%s2464_s6] sm:$0xff] }
  0x18   :  { %586 = vperm.xlu1 %1827, %v572_v36   ;;  %v1049_v45 = vld [vmem:[%s2464_s6 + $0x8] sm:$0xff]  ;;  %v1050_v46 = vld [vmem:[%s2464_s6 + $0x10] sm:$0xff]  ;;  %v1051_v47 = vld [vmem:[%s2464_s6 + $0x18] sm:$0xff] }
  0x19   :  { %591 = vperm.xlu0 %1826, %v573_v37   ;;  %v1052_v48 = vld [vmem:[%s2464_s6 + $0x20] sm:$0xff]  ;;  %v1053_v49 = vld [vmem:[%s2464_s6 + $0x28] sm:$0xff]  ;;  %v1054_v50 = vld [vmem:[%s2464_s6 + $0x30] sm:$0xff] }
  0x1a   :  { %1764 = vmatmul.mubr.msk.bf16.gmra.mrb[8].mxu0 %vm134_vm2, %v1838_v34  ;;  %1768 = vmatmul.mubr.msk.bf16.gmra.mrb[8].mxu1 %vm134_vm2, %v1838_v34  ;;  %v1055_v51 = vld [vmem:[%s2464_s6 + $0x38] sm:$0xff]  ;;  %v1517_v52 = vld [vmem:[%s2466_s8] sm:$0x3] }
  0x1b   :  { %237 = vmatprep.mubr.bf16.mxu0 %v1873_v6  ;;  %310 = vmatprep.mubr.bf16.mxu1 %v1873_v6 }
  0x1c   :  { %596 = vperm.xlu1 %1827, %v574_v38  }
  0x1d   :  { %601 = vperm.xlu0 %1826, %v575_v40  }
  0x20   :  { %606 = vperm.xlu1 %1827, %v576_v41  }
  0x21   :  { %611 = vperm.xlu0 %1826, %v577_v42  }
  0x22   :  { %1765 = vmatmul.mubr.msk.bf16.gmra.mrb[12].mxu0 %vm134_vm2, %v1839_v39  ;;  %1769 = vmatmul.mubr.msk.bf16.gmra.mrb[12].mxu1 %vm134_vm2, %v1839_v39 }
  0x23   :  { %353 = vmatprep.mubr.bf16.mxu0 %v1873_v6  ;;  %426 = vmatprep.mubr.bf16.mxu1 %v1873_v6 }
  0x24   :  { %616 = vperm.xlu1 %1827, %v578_v43  }
  0x25   :  { %1058 = vperm.xlu0 %1826, %v1048_v44  }
  0x28   :  { %1063 = vperm.xlu1 %1827, %v1049_v45  }
  0x29   :  { %1068 = vperm.xlu0 %1826, %v1050_v46  }
  0x2a   :  { %1770 = vmatmul.mubr.msk.bf16.vlgmr.msra.gmra.mrb[16].mxu0 %vm134_vm2, %v1945_v20  ;;  %1774 = vmatmul.mubr.msk.bf16.vlgmr.msra.gmra.mrb[16].mxu1 %vm134_vm2, %v1945_v20 }
  0x2b   :  { %363 = vmatprep.mubr.bf16.mxu0 %v1873_v6  ;;  %436 = vmatprep.mubr.bf16.mxu1 %v1873_v6 }
  0x2c   :  { %1073 = vperm.xlu1 %1827, %v1051_v47  }
  0x2d   :  { %1078 = vperm.xlu0 %1826, %v1052_v48  }
  0x30   :  { %1083 = vperm.xlu1 %1827, %v1053_v49  }
  0x31   :  { %1088 = vperm.xlu0 %1826, %v1054_v50  }
  0x32   :  { %1771 = vmatmul.mubr.msk.bf16.gmra.mrb[20].mxu0 %vm134_vm2, %v1837_v29  ;;  %1775 = vmatmul.mubr.msk.bf16.gmra.mrb[20].mxu1 %vm134_vm2, %v1837_v29 }
  0x33   :  { %373 = vmatprep.mubr.bf16.mxu0 %v1873_v6  ;;  %446 = vmatprep.mubr.bf16.mxu1 %v1873_v6 }
  0x34   :  { %1093 = vperm.xlu1 %1827, %v1055_v51  }
  0x35   :  { %1520 = vperm.xlu0 %1826, %v1517_v52  }
  0x3a   :  { %1772 = vmatmul.mubr.msk.bf16.gmra.mrb[24].mxu0 %vm134_vm2, %v1838_v34  ;;  %1776 = vmatmul.mubr.msk.bf16.gmra.mrb[24].mxu1 %vm134_vm2, %v1838_v34 }
  0x3b   :  { %383 = vmatprep.mubr.bf16.mxu0 %v1873_v6  ;;  %456 = vmatprep.mubr.bf16.mxu1 %v1873_v6 }
  0x42   :  { %1773 = vmatmul.mubr.msk.bf16.gmra.mrb[28].mxu0 %vm134_vm2, %v1839_v39  ;;  %1777 = vmatmul.mubr.msk.bf16.gmra.mrb[28].mxu1 %vm134_vm2, %v1839_v39 }
  0x43   :  { %684 = vmatprep.mubr.bf16.mxu0 %v1873_v6  ;;  %757 = vmatprep.mubr.bf16.mxu1 %v1873_v6 }
  0x83   :  { %v2067_v53 = vpop.permute.xlu0 %56 }
  0x84   :  { %v2069_v54 = vpop.permute.xlu1 %66 }
  0x88   :  { %v2071_v55 = vpop.permute.xlu0 %61  ;;  %v2081_v18 = vpop.permute.xlu1 %71 }
  0x8c   :  { %v2091_v44 = vpop.permute.xlu0 %76  ;;  %v2093_v48 = vpop.permute.xlu1 %81 }
  0xdd   :  { %v209_v56 = vpop.f32.mrb[0].mxu0  ;;  %v282_v58 = vpop.f32.mrb[0].mxu1 }
  0xde   :  { %v210_v57 = vadd.f32 %v209_v56, %v2067_v53  ;;  %v211_v59 = vpop.f32.mrb[1].mxu0  ;;  %v283_v60 = vadd.f32 %v282_v58, %v2067_v53  ;;  %v284_v62 = vpop.f32.mrb[1].mxu1 }
  0xdf   :  { %v212_v61 = vadd.f32 %v211_v59, %v2067_v53  ;;  %v213_v63 = vpop.f32.mrb[2].mxu0  ;;  %v285_v0 = vadd.f32 %v284_v62, %v2067_v53  ;;  %v286_v2 = vpop.f32.mrb[2].mxu1 }
  0xe0   :  { %v214_v1 = vadd.f32 %v213_v63, %v2071_v55  ;;  %v215_v3 = vpop.f32.mrb[3].mxu0  ;;  %v287_v4 = vadd.f32 %v286_v2, %v2071_v55  ;;  %v288_v7 = vpop.f32.mrb[3].mxu1  ;;  %v467_v8 = vmax.f32 %v210_v57, 0.0  ;;  %v469_v11 = vmax.f32 %v283_v60, 0.0 }
  0xe1   :  { %v216_v5 = vadd.f32 %v215_v3, %v2071_v55  ;;  %v289_v10 = vadd.f32 %v288_v7, %v2071_v55  ;;  %v468_v12 = vmax.f32 %v212_v61, 0.0  ;;  %v470_v15 = vmax.f32 %v285_v0, 0.0 }
  0xe2   :  { %v475_v9 = vmax.f32 %v214_v1, 0.0  ;;  %v477_v13 = vmax.f32 %v287_v4, 0.0 }
  0xe3   :  { %v476_v14 = vmax.f32 %v216_v5, 0.0  ;;  %v478_v17 = vmax.f32 %v289_v10, 0.0 }
  0xe4   :  { %v539_v16 = vpack.c.bf16 %v475_v9, %v467_v8  ;;  %v541_v19 = vpack.c.bf16 %v477_v13, %v469_v11 }
  0xe5   :  { %v540_v20 = vpack.c.bf16 %v476_v14, %v468_v12  ;;  %v219_v21 = vpop.f32.mrb[4].mxu0  ;;  %v542_v22 = vpack.c.bf16 %v478_v17, %v470_v15  ;;  %v292_v24 = vpop.f32.mrb[4].mxu1 }
  0xe6   :  { %v220_v23 = vadd.f32 %v219_v21, %v2069_v54  ;;  %v221_v25 = vpop.f32.mrb[5].mxu0  ;;  %v293_v26 = vadd.f32 %v292_v24, %v2069_v54  ;;  %v294_v28 = vpop.f32.mrb[5].mxu1 }
  0xe7   :  { %v222_v27 = vadd.f32 %v221_v25, %v2069_v54  ;;  %v223_v29 = vpop.f32.mrb[6].mxu0  ;;  %652 = vmatprep.subr.bf16.mxu0 %v540_v20  ;;  %v295_v30 = vadd.f32 %v294_v28, %v2069_v54  ;;  %v296_v32 = vpop.f32.mrb[6].mxu1  ;;  %725 = vmatprep.subr.bf16.mxu1 %v542_v22 }
  0xe8   :  { %v224_v31 = vadd.f32 %v223_v29, %v2081_v18  ;;  %v225_v33 = vpop.f32.mrb[7].mxu0  ;;  %653 = vmatpush1.bf16.msra.mxu0 %v539_v16  ;;  %v297_v34 = vadd.f32 %v296_v32, %v2081_v18  ;;  %v298_v36 = vpop.f32.mrb[7].mxu1  ;;  %726 = vmatpush1.bf16.msra.mxu1 %v541_v19  ;;  %v483_v37 = vmax.f32 %v220_v23, 0.0  ;;  %v485_v40 = vmax.f32 %v293_v26, 0.0 }
  0xe9   :  { %v226_v35 = vadd.f32 %v225_v33, %v2081_v18  ;;  %v299_v39 = vadd.f32 %v298_v36, %v2081_v18  ;;  %v484_v41 = vmax.f32 %v222_v27, 0.0  ;;  %v486_v45 = vmax.f32 %v295_v30, 0.0  ;;  %v2103_v14 = vpop.permute.xlu0 %86  ;;  %v2105_v19 = vpop.permute.xlu1 %91 }
  0xea   :  { %v491_v38 = vmax.f32 %v224_v31, 0.0  ;;  %v493_v42 = vmax.f32 %v297_v34, 0.0 }
  0xeb   :  { %v492_v43 = vmax.f32 %v226_v35, 0.0  ;;  %v494_v47 = vmax.f32 %v299_v39, 0.0 }
  0xec   :  { %v547_v46 = vpack.c.bf16 %v491_v38, %v483_v37  ;;  %v549_v49 = vpack.c.bf16 %v493_v42, %v485_v40 }
  0xed   :  { %v548_v50 = vpack.c.bf16 %v492_v43, %v484_v41  ;;  %v229_v51 = vpop.f32.mrb[8].mxu0  ;;  %v550_v52 = vpack.c.bf16 %v494_v47, %v486_v45  ;;  %v302_v57 = vpop.f32.mrb[8].mxu1 }
  0xee   :  { %v230_v56 = vadd.f32 %v229_v51, %v2091_v44  ;;  %v231_v58 = vpop.f32.mrb[9].mxu0  ;;  %v303_v59 = vadd.f32 %v302_v57, %v2091_v44  ;;  %v304_v61 = vpop.f32.mrb[9].mxu1 }
  0xef   :  { %v232_v60 = vadd.f32 %v231_v58, %v2091_v44  ;;  %v233_v62 = vpop.f32.mrb[10].mxu0  ;;  %654 = vmatprep.subr.bf16.mxu0 %v548_v50  ;;  %v305_v63 = vadd.f32 %v304_v61, %v2091_v44  ;;  %v306_v1 = vpop.f32.mrb[10].mxu1  ;;  %727 = vmatprep.subr.bf16.mxu1 %v550_v52 }
  0xf0   :  { %v234_v0 = vadd.f32 %v233_v62, %v2093_v48  ;;  %v235_v2 = vpop.f32.mrb[11].mxu0  ;;  %655 = vmatpush1.bf16.msra.mxu0 %v547_v46  ;;  %v307_v3 = vadd.f32 %v306_v1, %v2093_v48  ;;  %v308_v5 = vpop.f32.mrb[11].mxu1  ;;  %728 = vmatpush1.bf16.msra.mxu1 %v549_v49  ;;  %v499_v7 = vmax.f32 %v230_v56, 0.0  ;;  %v501_v10 = vmax.f32 %v303_v59, 0.0 }
  0xf1   :  { %v236_v4 = vadd.f32 %v235_v2, %v2093_v48  ;;  %v309_v9 = vadd.f32 %v308_v5, %v2093_v48  ;;  %v500_v11 = vmax.f32 %v232_v60, 0.0  ;;  %v502_v15 = vmax.f32 %v305_v63, 0.0 }
  0xf2   :  { %v507_v8 = vmax.f32 %v234_v0, 0.0  ;;  %v509_v12 = vmax.f32 %v307_v3, 0.0  ;;  %v2121_v0 = vld [vmem:[%s2461_s3] sm:$0xff]  }
  0xf3   :  { %v508_v13 = vmax.f32 %v236_v4, 0.0  ;;  %v510_v17 = vmax.f32 %v309_v9, 0.0 }
  0xf4   :  { %v555_v16 = vpack.c.bf16 %v507_v8, %v499_v7  ;;  %v557_v20 = vpack.c.bf16 %v509_v12, %v501_v10 }
  0xf5   :  { %v556_v21 = vpack.c.bf16 %v508_v13, %v500_v11  ;;  %v239_v22 = vpop.f32.mrb[12].mxu0  ;;  %v558_v23 = vpack.c.bf16 %v510_v17, %v502_v15  ;;  %v312_v25 = vpop.f32.mrb[12].mxu1 }
  0xf6   :  { %v240_v24 = vadd.f32 %v239_v22, %v2103_v14  ;;  %v241_v26 = vpop.f32.mrb[13].mxu0  ;;  %v313_v27 = vadd.f32 %v312_v25, %v2103_v14  ;;  %v314_v29 = vpop.f32.mrb[13].mxu1 }
  0xf7   :  { %v242_v28 = vadd.f32 %v241_v26, %v2103_v14  ;;  %v243_v30 = vpop.f32.mrb[14].mxu0  ;;  %656 = vmatprep.subr.bf16.mxu0 %v556_v21  ;;  %v315_v31 = vadd.f32 %v314_v29, %v2103_v14  ;;  %v316_v33 = vpop.f32.mrb[14].mxu1  ;;  %729 = vmatprep.subr.bf16.mxu1 %v558_v23 }
  0xf8   :  { %v244_v32 = vadd.f32 %v243_v30, %v2105_v19  ;;  %v245_v34 = vpop.f32.mrb[15].mxu0  ;;  %657 = vmatpush1.bf16.msra.mxu0 %v555_v16  ;;  %v317_v35 = vadd.f32 %v316_v33, %v2105_v19  ;;  %v318_v37 = vpop.f32.mrb[15].mxu1  ;;  %730 = vmatpush1.bf16.msra.mxu1 %v557_v20  ;;  %v515_v38 = vmax.f32 %v240_v24, 0.0  ;;  %v517_v41 = vmax.f32 %v313_v27, 0.0 }
  0xf9   :  { %v246_v36 = vadd.f32 %v245_v34, %v2105_v19  ;;  %v319_v40 = vadd.f32 %v318_v37, %v2105_v19  ;;  %v516_v42 = vmax.f32 %v242_v28, 0.0  ;;  %v518_v46 = vmax.f32 %v315_v31, 0.0  ;;  %v2140_v31 = vld [vmem:[%s2461_s3 + $0x8] sm:$0xff]  }
  0xfa   :  { %v523_v39 = vmax.f32 %v244_v32, 0.0  ;;  %v525_v43 = vmax.f32 %v317_v35, 0.0 }
  0xfb   :  { %v524_v45 = vmax.f32 %v246_v36, 0.0  ;;  %v526_v49 = vmax.f32 %v319_v40, 0.0 }
  0xfc   :  { %v563_v47 = vpack.c.bf16 %v523_v39, %v515_v38  ;;  %v565_v50 = vpack.c.bf16 %v525_v43, %v517_v41 }
  0xfd   :  { %v564_v51 = vpack.c.bf16 %v524_v45, %v516_v42  ;;  %v355_v52 = vpop.f32.mrb[16].mxu0  ;;  %v566_v56 = vpack.c.bf16 %v526_v49, %v518_v46  ;;  %v428_v58 = vpop.f32.mrb[16].mxu1 }
  0xfe   :  { %v356_v57 = vadd.f32 %v355_v52, %v2067_v53  ;;  %v357_v59 = vpop.f32.mrb[17].mxu0  ;;  %v429_v60 = vadd.f32 %v428_v58, %v2067_v53  ;;  %v430_v62 = vpop.f32.mrb[17].mxu1 }
  0xff   :  { %v358_v61 = vadd.f32 %v357_v59, %v2067_v53  ;;  %v359_v63 = vpop.f32.mrb[18].mxu0  ;;  %658 = vmatprep.subr.bf16.mxu0 %v564_v51  ;;  %v431_v1 = vadd.f32 %v430_v62, %v2067_v53  ;;  %v432_v3 = vpop.f32.mrb[18].mxu1  ;;  %731 = vmatprep.subr.bf16.mxu1 %v566_v56 }
 0x100   :  { %v360_v2 = vadd.f32 %v359_v63, %v2071_v55  ;;  %v361_v4 = vpop.f32.mrb[19].mxu0  ;;  %659 = vmatpush1.bf16.msra.mxu0 %v563_v47  ;;  %v433_v5 = vadd.f32 %v432_v3, %v2071_v55  ;;  %v434_v8 = vpop.f32.mrb[19].mxu1  ;;  %732 = vmatpush1.bf16.msra.mxu1 %v565_v50  ;;  %v471_v9 = vmax.f32 %v356_v57, 0.0  ;;  %v473_v12 = vmax.f32 %v429_v60, 0.0  ;;  %v2159_v63 = vld [vmem:[%s2461_s3 + $0x10] sm:$0xff]  }
 0x101   :  { %v362_v7 = vadd.f32 %v361_v4, %v2071_v55  ;;  %v435_v11 = vadd.f32 %v434_v8, %v2071_v55  ;;  %v472_v13 = vmax.f32 %v358_v61, 0.0  ;;  %v474_v16 = vmax.f32 %v431_v1, 0.0 }
 0x102   :  { %v479_v10 = vmax.f32 %v360_v2, 0.0  ;;  %v481_v53 = vmax.f32 %v433_v5, 0.0 }
 0x103   :  { %v480_v15 = vmax.f32 %v362_v7, 0.0  ;;  %1782 = vmatmul.mubr.msk.bf16.vlgmr.msra.gmra.mrb[32].mxu0 %vm639_vm3, %v2121_v0  ;;  %v482_v20 = vmax.f32 %v435_v11, 0.0  ;;  %1786 = vmatmul.mubr.msk.bf16.vlgmr.msra.gmra.mrb[32].mxu1 %vm639_vm3, %v2121_v0 }
 0x104   :  { %v543_v17 = vpack.c.bf16 %v479_v10, %v471_v9  ;;  %694 = vmatprep.mubr.bf16.mxu0 %v1873_v6  ;;  %v545_v21 = vpack.c.bf16 %v481_v53, %v473_v12  ;;  %767 = vmatprep.mubr.bf16.mxu1 %v1873_v6 }
 0x105   :  { %v544_v22 = vpack.c.bf16 %v480_v15, %v472_v13  ;;  %v365_v23 = vpop.f32.mrb[20].mxu0  ;;  %v546_v55 = vpack.c.bf16 %v482_v20, %v474_v16  ;;  %v438_v25 = vpop.f32.mrb[20].mxu1 }
 0x106   :  { %v366_v24 = vadd.f32 %v365_v23, %v2069_v54  ;;  %v367_v26 = vpop.f32.mrb[21].mxu0  ;;  %v439_v27 = vadd.f32 %v438_v25, %v2069_v54  ;;  %v440_v29 = vpop.f32.mrb[21].mxu1 }
 0x107   :  { %v368_v28 = vadd.f32 %v367_v26, %v2069_v54  ;;  %v369_v30 = vpop.f32.mrb[22].mxu0  ;;  %798 = vmatprep.subr.bf16.mxu0 %v544_v22  ;;  %v441_v32 = vadd.f32 %v440_v29, %v2069_v54  ;;  %v442_v34 = vpop.f32.mrb[22].mxu1  ;;  %871 = vmatprep.subr.bf16.mxu1 %v546_v55  ;;  %v1843_v29 = vld [vmem:[%s2461_s3 + $0x18] sm:$0xff]  }
 0x108   :  { %v370_v33 = vadd.f32 %v369_v30, %v2081_v18  ;;  %v371_v35 = vpop.f32.mrb[23].mxu0  ;;  %799 = vmatpush1.bf16.msra.mxu0 %v543_v17  ;;  %v443_v36 = vadd.f32 %v442_v34, %v2081_v18  ;;  %v444_v38 = vpop.f32.mrb[23].mxu1  ;;  %872 = vmatpush1.bf16.msra.mxu1 %v545_v21  ;;  %v487_v39 = vmax.f32 %v366_v24, 0.0  ;;  %v489_v42 = vmax.f32 %v439_v27, 0.0 }
 0x109   :  { %v372_v37 = vadd.f32 %v371_v35, %v2081_v18  ;;  %v445_v41 = vadd.f32 %v444_v38, %v2081_v18  ;;  %v488_v43 = vmax.f32 %v368_v28, 0.0  ;;  %v490_v46 = vmax.f32 %v441_v32, 0.0 }
 0x10a   :  { %v495_v40 = vmax.f32 %v370_v33, 0.0  ;;  %v497_v45 = vmax.f32 %v443_v36, 0.0 }
 0x10b   :  { %v496_v54 = vmax.f32 %v372_v37, 0.0  ;;  %1783 = vmatmul.mubr.msk.bf16.gmra.mrb[36].mxu0 %vm639_vm3, %v2140_v31  ;;  %v498_v49 = vmax.f32 %v445_v41, 0.0  ;;  %1787 = vmatmul.mubr.msk.bf16.gmra.mrb[36].mxu1 %vm639_vm3, %v2140_v31 }
 0x10c   :  { %v551_v47 = vpack.c.bf16 %v495_v40, %v487_v39  ;;  %704 = vmatprep.mubr.bf16.mxu0 %v1873_v6  ;;  %v553_v50 = vpack.c.bf16 %v497_v45, %v489_v42  ;;  %777 = vmatprep.mubr.bf16.mxu1 %v1873_v6 }
 0x10d   :  { %v552_v51 = vpack.c.bf16 %v496_v54, %v488_v43  ;;  %v375_v52 = vpop.f32.mrb[24].mxu0  ;;  %v554_v18 = vpack.c.bf16 %v498_v49, %v490_v46  ;;  %v448_v57 = vpop.f32.mrb[24].mxu1 }
 0x10e   :  { %v376_v56 = vadd.f32 %v375_v52, %v2091_v44  ;;  %v377_v58 = vpop.f32.mrb[25].mxu0  ;;  %v449_v59 = vadd.f32 %v448_v57, %v2091_v44  ;;  %v450_v61 = vpop.f32.mrb[25].mxu1 }
 0x10f   :  { %v378_v60 = vadd.f32 %v377_v58, %v2091_v44  ;;  %v379_v62 = vpop.f32.mrb[26].mxu0  ;;  %800 = vmatprep.subr.bf16.mxu0 %v552_v51  ;;  %v451_v1 = vadd.f32 %v450_v61, %v2091_v44  ;;  %v452_v3 = vpop.f32.mrb[26].mxu1  ;;  %873 = vmatprep.subr.bf16.mxu1 %v554_v18 }
 0x110   :  { %v380_v2 = vadd.f32 %v379_v62, %v2093_v48  ;;  %v381_v4 = vpop.f32.mrb[27].mxu0  ;;  %801 = vmatpush1.bf16.msra.mxu0 %v551_v47  ;;  %v453_v5 = vadd.f32 %v452_v3, %v2093_v48  ;;  %v454_v8 = vpop.f32.mrb[27].mxu1  ;;  %874 = vmatpush1.bf16.msra.mxu1 %v553_v50  ;;  %v503_v9 = vmax.f32 %v376_v56, 0.0  ;;  %v505_v12 = vmax.f32 %v449_v59, 0.0 }
 0x111   :  { %v382_v7 = vadd.f32 %v381_v4, %v2093_v48  ;;  %v455_v11 = vadd.f32 %v454_v8, %v2093_v48  ;;  %v504_v13 = vmax.f32 %v378_v60, 0.0  ;;  %v506_v15 = vmax.f32 %v451_v1, 0.0 }
 0x112   :  { %v511_v10 = vmax.f32 %v380_v2, 0.0  ;;  %v513_v53 = vmax.f32 %v453_v5, 0.0 }
 0x113   :  { %v512_v44 = vmax.f32 %v382_v7, 0.0  ;;  %1784 = vmatmul.mubr.msk.bf16.gmra.mrb[40].mxu0 %vm639_vm3, %v2159_v63  ;;  %v514_v17 = vmax.f32 %v455_v11, 0.0  ;;  %1788 = vmatmul.mubr.msk.bf16.gmra.mrb[40].mxu1 %vm639_vm3, %v2159_v63 }
 0x114   :  { %v559_v16 = vpack.c.bf16 %v511_v10, %v503_v9  ;;  %714 = vmatprep.mubr.bf16.mxu0 %v1873_v6  ;;  %v561_v20 = vpack.c.bf16 %v513_v53, %v505_v12  ;;  %787 = vmatprep.mubr.bf16.mxu1 %v1873_v6 }
 0x115   :  { %v560_v21 = vpack.c.bf16 %v512_v44, %v504_v13  ;;  %v385_v22 = vpop.f32.mrb[28].mxu0  ;;  %v562_v48 = vpack.c.bf16 %v514_v17, %v506_v15  ;;  %v458_v55 = vpop.f32.mrb[28].mxu1 }
 0x116   :  { %v386_v23 = vadd.f32 %v385_v22, %v2103_v14  ;;  %v387_v24 = vpop.f32.mrb[29].mxu0  ;;  %v459_v25 = vadd.f32 %v458_v55, %v2103_v14  ;;  %v460_v27 = vpop.f32.mrb[29].mxu1 }
 0x117   :  { %v388_v26 = vadd.f32 %v387_v24, %v2103_v14  ;;  %v389_v28 = vpop.f32.mrb[30].mxu0  ;;  %802 = vmatprep.subr.bf16.mxu0 %v560_v21  ;;  %v461_v30 = vadd.f32 %v460_v27, %v2103_v14  ;;  %v462_v33 = vpop.f32.mrb[30].mxu1  ;;  %875 = vmatprep.subr.bf16.mxu1 %v562_v48 }
 0x118   :  { %v390_v32 = vadd.f32 %v389_v28, %v2105_v19  ;;  %v391_v34 = vpop.f32.mrb[31].mxu0  ;;  %803 = vmatpush1.bf16.msra.mxu0 %v559_v16  ;;  %v463_v35 = vadd.f32 %v462_v33, %v2105_v19  ;;  %v464_v37 = vpop.f32.mrb[31].mxu1  ;;  %876 = vmatpush1.bf16.msra.mxu1 %v561_v20  ;;  %v519_v38 = vmax.f32 %v386_v23, 0.0  ;;  %v521_v41 = vmax.f32 %v459_v25, 0.0 }
 0x119   :  { %v392_v36 = vadd.f32 %v391_v34, %v2105_v19  ;;  %v465_v40 = vadd.f32 %v464_v37, %v2105_v19  ;;  %v520_v42 = vmax.f32 %v388_v26, 0.0  ;;  %v522_v45 = vmax.f32 %v461_v30, 0.0  ;;  %v2209_v19 = vpop.permute.xlu0 %581 }
 0x11a   :  { %v527_v39 = vmax.f32 %v390_v32, 0.0  ;;  %v529_v43 = vmax.f32 %v463_v35, 0.0 }
 0x11b   :  { %v528_v14 = vmax.f32 %v392_v36, 0.0  ;;  %1785 = vmatmul.mubr.msk.bf16.gmra.mrb[44].mxu0 %vm639_vm3, %v1843_v29  ;;  %v530_v46 = vmax.f32 %v465_v40, 0.0  ;;  %1789 = vmatmul.mubr.msk.bf16.gmra.mrb[44].mxu1 %vm639_vm3, %v1843_v29 }
 0x11c   :  { %v567_v54 = vpack.c.bf16 %v527_v39, %v519_v38  ;;  %830 = vmatprep.mubr.bf16.mxu0 %v1873_v6  ;;  %v569_v47 = vpack.c.bf16 %v529_v43, %v521_v41  ;;  %903 = vmatprep.mubr.bf16.mxu1 %v1873_v6 }
 0x11d   :  { %v568_v49 = vpack.c.bf16 %v528_v14, %v520_v42  ;;  %v570_v50 = vpack.c.bf16 %v530_v46, %v522_v45  ;;  %v2221_v12 = vpop.permute.xlu0 %591 }
 0x11f   :  { %804 = vmatprep.subr.bf16.mxu0 %v568_v49  ;;  %877 = vmatprep.subr.bf16.mxu1 %v570_v50 }
 0x120   :  { %805 = vmatpush1.bf16.msra.mxu0 %v567_v54  ;;  %878 = vmatpush1.bf16.msra.mxu1 %v569_v47 }
 0x121   :  { %v2233_v42 = vpop.permute.xlu0 %601 }
 0x123   :  { %1790 = vmatmul.mubr.msk.bf16.vlgmr.msra.gmra.mrb[48].mxu0 %vm639_vm3, %v2121_v0  ;;  %1794 = vmatmul.mubr.msk.bf16.vlgmr.msra.gmra.mrb[48].mxu1 %vm639_vm3, %v2121_v0  ;;  %v2211_v0 = vpop.permute.xlu1 %586 }
 0x124   :  { %840 = vmatprep.mubr.bf16.mxu0 %v1873_v6  ;;  %913 = vmatprep.mubr.bf16.mxu1 %v1873_v6 }
 0x127   :  { %v2223_v15 = vpop.permute.xlu1 %596 }
 0x12b   :  { %1791 = vmatmul.mubr.msk.bf16.gmra.mrb[52].mxu0 %vm639_vm3, %v2140_v31  ;;  %1795 = vmatmul.mubr.msk.bf16.gmra.mrb[52].mxu1 %vm639_vm3, %v2140_v31  ;;  %v2235_v54 = vpop.permute.xlu1 %606 }
 0x12c   :  { %850 = vmatprep.mubr.bf16.mxu0 %v1873_v6  ;;  %923 = vmatprep.mubr.bf16.mxu1 %v1873_v6 }
 0x133   :  { %1792 = vmatmul.mubr.msk.bf16.gmra.mrb[56].mxu0 %vm639_vm3, %v2159_v63  ;;  %1796 = vmatmul.mubr.msk.bf16.gmra.mrb[56].mxu1 %vm639_vm3, %v2159_v63 }
 0x134   :  { %860 = vmatprep.mubr.bf16.mxu0 %v1873_v6  ;;  %933 = vmatprep.mubr.bf16.mxu1 %v1873_v6 }
 0x13b   :  { %1793 = vmatmul.mubr.msk.bf16.gmra.mrb[60].mxu0 %vm639_vm3, %v1843_v29  ;;  %1797 = vmatmul.mubr.msk.bf16.gmra.mrb[60].mxu1 %vm639_vm3, %v1843_v29 }
 0x13c   :  { %1160 = vmatprep.mubr.bf16.mxu0 %v1873_v6  ;;  %1233 = vmatprep.mubr.bf16.mxu1 %v1873_v6 }
 0x1d6   :  { %v686_v31 = vpop.f32.mrb[32].mxu0  ;;  %v759_v52 = vpop.f32.mrb[32].mxu1 }
 0x1d7   :  { %v687_v51 = vadd.f32 %v686_v31, %v2209_v19  ;;  %v688_v18 = vpop.f32.mrb[33].mxu0  ;;  %v760_v56 = vadd.f32 %v759_v52, %v2209_v19  ;;  %v761_v58 = vpop.f32.mrb[33].mxu1 }
 0x1d8   :  { %v689_v57 = vadd.f32 %v688_v18, %v2209_v19  ;;  %v690_v59 = vpop.f32.mrb[34].mxu0  ;;  %v762_v60 = vadd.f32 %v761_v58, %v2209_v19  ;;  %v763_v62 = vpop.f32.mrb[34].mxu1 }
 0x1d9   :  { %v691_v61 = vadd.f32 %v690_v59, %v2211_v0  ;;  %v692_v63 = vpop.f32.mrb[35].mxu0  ;;  %v764_v1 = vadd.f32 %v763_v62, %v2211_v0  ;;  %v765_v3 = vpop.f32.mrb[35].mxu1  ;;  %v944_v4 = vmax.f32 %v687_v51, 0.0  ;;  %v946_v8 = vmax.f32 %v760_v56, 0.0 }
 0x1da   :  { %v693_v2 = vadd.f32 %v692_v63, %v2211_v0  ;;  %v766_v7 = vadd.f32 %v765_v3, %v2211_v0  ;;  %v945_v9 = vmax.f32 %v689_v57, 0.0  ;;  %v947_v13 = vmax.f32 %v762_v60, 0.0 }
 0x1db   :  { %v952_v5 = vmax.f32 %v691_v61, 0.0  ;;  %v954_v10 = vmax.f32 %v764_v1, 0.0 }
 0x1dc   :  { %v953_v11 = vmax.f32 %v693_v2, 0.0  ;;  %v955_v44 = vmax.f32 %v766_v7, 0.0 }
 0x1dd   :  { %v1016_v53 = vpack.c.bf16 %v952_v5, %v944_v4  ;;  %v1018_v16 = vpack.c.bf16 %v954_v10, %v946_v8 }
 0x1de   :  { %v1017_v17 = vpack.c.bf16 %v953_v11, %v945_v9  ;;  %v696_v20 = vpop.f32.mrb[36].mxu0  ;;  %v1019_v21 = vpack.c.bf16 %v955_v44, %v947_v13  ;;  %v769_v48 = vpop.f32.mrb[36].mxu1 }
 0x1df   :  { %v697_v22 = vadd.f32 %v696_v20, %v2221_v12  ;;  %v698_v23 = vpop.f32.mrb[37].mxu0  ;;  %v770_v55 = vadd.f32 %v769_v48, %v2221_v12  ;;  %v771_v25 = vpop.f32.mrb[37].mxu1 }
 0x1e0   :  { %v699_v24 = vadd.f32 %v698_v23, %v2221_v12  ;;  %v700_v26 = vpop.f32.mrb[38].mxu0  ;;  %1128 = vmatprep.subr.bf16.mxu0 %v1017_v17  ;;  %v772_v27 = vadd.f32 %v771_v25, %v2221_v12  ;;  %v773_v29 = vpop.f32.mrb[38].mxu1  ;;  %1201 = vmatprep.subr.bf16.mxu1 %v1019_v21 }
 0x1e1   :  { %v701_v28 = vadd.f32 %v700_v26, %v2223_v15  ;;  %v702_v30 = vpop.f32.mrb[39].mxu0  ;;  %1129 = vmatpush1.bf16.msra.mxu0 %v1016_v53  ;;  %v774_v32 = vadd.f32 %v773_v29, %v2223_v15  ;;  %v775_v34 = vpop.f32.mrb[39].mxu1  ;;  %1202 = vmatpush1.bf16.msra.mxu1 %v1018_v16  ;;  %v960_v35 = vmax.f32 %v697_v22, 0.0  ;;  %v962_v38 = vmax.f32 %v770_v55, 0.0 }
 0x1e2   :  { %v703_v33 = vadd.f32 %v702_v30, %v2223_v15  ;;  %v776_v37 = vadd.f32 %v775_v34, %v2223_v15  ;;  %v961_v39 = vmax.f32 %v699_v24, 0.0  ;;  %v963_v43 = vmax.f32 %v772_v27, 0.0  ;;  %v2245_v11 = vpop.permute.xlu0 %611  ;;  %v2247_v16 = vpop.permute.xlu1 %616 }
 0x1e3   :  { %v968_v36 = vmax.f32 %v701_v28, 0.0  ;;  %v970_v40 = vmax.f32 %v774_v32, 0.0 }
 0x1e4   :  { %v969_v41 = vmax.f32 %v703_v33, 0.0  ;;  %v971_v45 = vmax.f32 %v776_v37, 0.0 }
 0x1e5   :  { %v1024_v14 = vpack.c.bf16 %v968_v36, %v960_v35  ;;  %v1026_v46 = vpack.c.bf16 %v970_v40, %v962_v38 }
 0x1e6   :  { %v1025_v47 = vpack.c.bf16 %v969_v41, %v961_v39  ;;  %v706_v49 = vpop.f32.mrb[40].mxu0  ;;  %v1027_v50 = vpack.c.bf16 %v971_v45, %v963_v43  ;;  %v779_v51 = vpop.f32.mrb[40].mxu1 }
 0x1e7   :  { %v707_v31 = vadd.f32 %v706_v49, %v2233_v42  ;;  %v708_v52 = vpop.f32.mrb[41].mxu0  ;;  %v780_v18 = vadd.f32 %v779_v51, %v2233_v42  ;;  %v781_v57 = vpop.f32.mrb[41].mxu1 }
 0x1e8   :  { %v709_v56 = vadd.f32 %v708_v52, %v2233_v42  ;;  %v710_v58 = vpop.f32.mrb[42].mxu0  ;;  %1130 = vmatprep.subr.bf16.mxu0 %v1025_v47  ;;  %v782_v59 = vadd.f32 %v781_v57, %v2233_v42  ;;  %v783_v61 = vpop.f32.mrb[42].mxu1  ;;  %1203 = vmatprep.subr.bf16.mxu1 %v1027_v50 }
 0x1e9   :  { %v711_v60 = vadd.f32 %v710_v58, %v2235_v54  ;;  %v712_v62 = vpop.f32.mrb[43].mxu0  ;;  %1131 = vmatpush1.bf16.msra.mxu0 %v1024_v14  ;;  %v784_v63 = vadd.f32 %v783_v61, %v2235_v54  ;;  %v785_v2 = vpop.f32.mrb[43].mxu1  ;;  %1204 = vmatpush1.bf16.msra.mxu1 %v1026_v46  ;;  %v976_v3 = vmax.f32 %v707_v31, 0.0  ;;  %v978_v7 = vmax.f32 %v780_v18, 0.0 }
 0x1ea   :  { %v713_v1 = vadd.f32 %v712_v62, %v2235_v54  ;;  %v786_v5 = vadd.f32 %v785_v2, %v2235_v54  ;;  %v977_v8 = vmax.f32 %v709_v56, 0.0  ;;  %v979_v13 = vmax.f32 %v782_v59, 0.0 }
 0x1eb   :  { %v984_v4 = vmax.f32 %v711_v60, 0.0  ;;  %v986_v9 = vmax.f32 %v784_v63, 0.0  ;;  %v2263_v60 = vld [vmem:[%s2463_s5] sm:$0xff]  }
 0x1ec   :  { %v985_v10 = vmax.f32 %v713_v1, 0.0  ;;  %v987_v44 = vmax.f32 %v786_v5, 0.0 }
 0x1ed   :  { %v1032_v53 = vpack.c.bf16 %v984_v4, %v976_v3  ;;  %v1034_v17 = vpack.c.bf16 %v986_v9, %v978_v7 }
 0x1ee   :  { %v1033_v20 = vpack.c.bf16 %v985_v10, %v977_v8  ;;  %v716_v21 = vpop.f32.mrb[44].mxu0  ;;  %v1035_v22 = vpack.c.bf16 %v987_v44, %v979_v13  ;;  %v789_v23 = vpop.f32.mrb[44].mxu1 }
 0x1ef   :  { %v717_v48 = vadd.f32 %v716_v21, %v2245_v11  ;;  %v718_v55 = vpop.f32.mrb[45].mxu0  ;;  %v790_v24 = vadd.f32 %v789_v23, %v2245_v11  ;;  %v791_v26 = vpop.f32.mrb[45].mxu1 }
 0x1f0   :  { %v719_v25 = vadd.f32 %v718_v55, %v2245_v11  ;;  %v720_v27 = vpop.f32.mrb[46].mxu0  ;;  %1132 = vmatprep.subr.bf16.mxu0 %v1033_v20  ;;  %v792_v28 = vadd.f32 %v791_v26, %v2245_v11  ;;  %v793_v30 = vpop.f32.mrb[46].mxu1  ;;  %1205 = vmatprep.subr.bf16.mxu1 %v1035_v22 }
 0x1f1   :  { %v721_v29 = vadd.f32 %v720_v27, %v2247_v16  ;;  %v722_v32 = vpop.f32.mrb[47].mxu0  ;;  %1133 = vmatpush1.bf16.msra.mxu0 %v1032_v53  ;;  %v794_v33 = vadd.f32 %v793_v30, %v2247_v16  ;;  %v795_v35 = vpop.f32.mrb[47].mxu1  ;;  %1206 = vmatpush1.bf16.msra.mxu1 %v1034_v17  ;;  %v992_v36 = vmax.f32 %v717_v48, 0.0  ;;  %v994_v39 = vmax.f32 %v790_v24, 0.0 }
 0x1f2   :  { %v723_v34 = vadd.f32 %v722_v32, %v2247_v16  ;;  %v796_v38 = vadd.f32 %v795_v35, %v2247_v16  ;;  %v993_v40 = vmax.f32 %v719_v25, 0.0  ;;  %v995_v14 = vmax.f32 %v792_v28, 0.0  ;;  %v2282_v28 = vld [vmem:[%s2463_s5 + $0x8] sm:$0xff]  }
 0x1f3   :  { %v1000_v37 = vmax.f32 %v721_v29, 0.0  ;;  %v1002_v41 = vmax.f32 %v794_v33, 0.0 }
 0x1f4   :  { %v1001_v43 = vmax.f32 %v723_v34, 0.0  ;;  %v1003_v46 = vmax.f32 %v796_v38, 0.0 }
 0x1f5   :  { %v1040_v45 = vpack.c.bf16 %v1000_v37, %v992_v36  ;;  %v1042_v47 = vpack.c.bf16 %v1002_v41, %v994_v39 }
 0x1f6   :  { %v1041_v49 = vpack.c.bf16 %v1001_v43, %v993_v40  ;;  %v832_v50 = vpop.f32.mrb[48].mxu0  ;;  %v1043_v31 = vpack.c.bf16 %v1003_v46, %v995_v14  ;;  %v905_v52 = vpop.f32.mrb[48].mxu1 }
 0x1f7   :  { %v833_v51 = vadd.f32 %v832_v50, %v2209_v19  ;;  %v834_v18 = vpop.f32.mrb[49].mxu0  ;;  %v906_v56 = vadd.f32 %v905_v52, %v2209_v19  ;;  %v907_v58 = vpop.f32.mrb[49].mxu1 }
 0x1f8   :  { %v835_v57 = vadd.f32 %v834_v18, %v2209_v19  ;;  %v836_v59 = vpop.f32.mrb[50].mxu0  ;;  %1134 = vmatprep.subr.bf16.mxu0 %v1041_v49  ;;  %v908_v61 = vadd.f32 %v907_v58, %v2209_v19  ;;  %v909_v63 = vpop.f32.mrb[50].mxu1  ;;  %1207 = vmatprep.subr.bf16.mxu1 %v1043_v31 }
 0x1f9   :  { %v837_v62 = vadd.f32 %v836_v59, %v2211_v0  ;;  %v838_v1 = vpop.f32.mrb[51].mxu0  ;;  %1135 = vmatpush1.bf16.msra.mxu0 %v1040_v45  ;;  %v910_v2 = vadd.f32 %v909_v63, %v2211_v0  ;;  %v911_v4 = vpop.f32.mrb[51].mxu1  ;;  %1208 = vmatpush1.bf16.msra.mxu1 %v1042_v47  ;;  %v948_v5 = vmax.f32 %v833_v51, 0.0  ;;  %v950_v9 = vmax.f32 %v906_v56, 0.0  ;;  %v2301_v59 = vld [vmem:[%s2463_s5 + $0x10] sm:$0xff]  }
 0x1fa   :  { %v839_v3 = vadd.f32 %v838_v1, %v2211_v0  ;;  %v912_v8 = vadd.f32 %v911_v4, %v2211_v0  ;;  %v949_v10 = vmax.f32 %v835_v57, 0.0  ;;  %v951_v53 = vmax.f32 %v908_v61, 0.0 }
 0x1fb   :  { %v956_v7 = vmax.f32 %v837_v62, 0.0  ;;  %v958_v13 = vmax.f32 %v910_v2, 0.0 }
 0x1fc   :  { %v957_v19 = vmax.f32 %v839_v3, 0.0  ;;  %1802 = vmatmul.mubr.msk.bf16.vlgmr.msra.gmra.mrb[64].mxu0 %vm639_vm3, %v2263_v60  ;;  %v959_v17 = vmax.f32 %v912_v8, 0.0  ;;  %1806 = vmatmul.mubr.msk.bf16.vlgmr.msra.gmra.mrb[64].mxu1 %vm639_vm3, %v2263_v60 }
 0x1fd   :  { %v1020_v44 = vpack.c.bf16 %v956_v7, %v948_v5  ;;  %1170 = vmatprep.mubr.bf16.mxu0 %v1873_v6  ;;  %v1022_v20 = vpack.c.bf16 %v958_v13, %v950_v9  ;;  %1243 = vmatprep.mubr.bf16.mxu1 %v1873_v6 }
 0x1fe   :  { %v1021_v21 = vpack.c.bf16 %v957_v19, %v949_v10  ;;  %v842_v22 = vpop.f32.mrb[52].mxu0  ;;  %v1023_v0 = vpack.c.bf16 %v959_v17, %v951_v53  ;;  %v915_v23 = vpop.f32.mrb[52].mxu1 }
 0x1ff   :  { %v843_v48 = vadd.f32 %v842_v22, %v2221_v12  ;;  %v844_v55 = vpop.f32.mrb[53].mxu0  ;;  %v916_v24 = vadd.f32 %v915_v23, %v2221_v12  ;;  %v917_v26 = vpop.f32.mrb[53].mxu1 }
 0x200   :  { %v845_v25 = vadd.f32 %v844_v55, %v2221_v12  ;;  %v846_v27 = vpop.f32.mrb[54].mxu0  ;;  %1274 = vmatprep.subr.bf16.mxu0 %v1021_v21  ;;  %v918_v29 = vadd.f32 %v917_v26, %v2221_v12  ;;  %v919_v32 = vpop.f32.mrb[54].mxu1  ;;  %1347 = vmatprep.subr.bf16.mxu1 %v1023_v0  ;;  %v1847_v26 = vld [vmem:[%s2463_s5 + $0x18] sm:$0xff]  }
 0x201   :  { %v847_v30 = vadd.f32 %v846_v27, %v2223_v15  ;;  %v848_v33 = vpop.f32.mrb[55].mxu0  ;;  %1275 = vmatpush1.bf16.msra.mxu0 %v1020_v44  ;;  %v920_v34 = vadd.f32 %v919_v32, %v2223_v15  ;;  %v921_v36 = vpop.f32.mrb[55].mxu1  ;;  %1348 = vmatpush1.bf16.msra.mxu1 %v1022_v20  ;;  %v964_v37 = vmax.f32 %v843_v48, 0.0  ;;  %v966_v40 = vmax.f32 %v916_v24, 0.0 }
 0x202   :  { %v849_v35 = vadd.f32 %v848_v33, %v2223_v15  ;;  %v922_v39 = vadd.f32 %v921_v36, %v2223_v15  ;;  %v965_v41 = vmax.f32 %v845_v25, 0.0  ;;  %v967_v14 = vmax.f32 %v918_v29, 0.0 }
 0x203   :  { %v972_v38 = vmax.f32 %v847_v30, 0.0  ;;  %v974_v43 = vmax.f32 %v920_v34, 0.0 }
 0x204   :  { %v973_v12 = vmax.f32 %v849_v35, 0.0  ;;  %1803 = vmatmul.mubr.msk.bf16.gmra.mrb[68].mxu0 %vm639_vm3, %v2282_v28  ;;  %v975_v46 = vmax.f32 %v922_v39, 0.0  ;;  %1807 = vmatmul.mubr.msk.bf16.gmra.mrb[68].mxu1 %vm639_vm3, %v2282_v28 }
 0x205   :  { %v1028_v45 = vpack.c.bf16 %v972_v38, %v964_v37  ;;  %1180 = vmatprep.mubr.bf16.mxu0 %v1873_v6  ;;  %v1030_v47 = vpack.c.bf16 %v974_v43, %v966_v40  ;;  %1253 = vmatprep.mubr.bf16.mxu1 %v1873_v6 }
 0x206   :  { %v1029_v49 = vpack.c.bf16 %v973_v12, %v965_v41  ;;  %v852_v50 = vpop.f32.mrb[56].mxu0  ;;  %v1031_v15 = vpack.c.bf16 %v975_v46, %v967_v14  ;;  %v925_v51 = vpop.f32.mrb[56].mxu1 }
 0x207   :  { %v853_v31 = vadd.f32 %v852_v50, %v2233_v42  ;;  %v854_v52 = vpop.f32.mrb[57].mxu0  ;;  %v926_v18 = vadd.f32 %v925_v51, %v2233_v42  ;;  %v927_v57 = vpop.f32.mrb[57].mxu1 }
 0x208   :  { %v855_v56 = vadd.f32 %v854_v52, %v2233_v42  ;;  %v856_v58 = vpop.f32.mrb[58].mxu0  ;;  %1276 = vmatprep.subr.bf16.mxu0 %v1029_v49  ;;  %v928_v61 = vadd.f32 %v927_v57, %v2233_v42  ;;  %v929_v63 = vpop.f32.mrb[58].mxu1  ;;  %1349 = vmatprep.subr.bf16.mxu1 %v1031_v15 }
 0x209   :  { %v857_v62 = vadd.f32 %v856_v58, %v2235_v54  ;;  %v858_v1 = vpop.f32.mrb[59].mxu0  ;;  %1277 = vmatpush1.bf16.msra.mxu0 %v1028_v45  ;;  %v930_v2 = vadd.f32 %v929_v63, %v2235_v54  ;;  %v931_v4 = vpop.f32.mrb[59].mxu1  ;;  %1350 = vmatpush1.bf16.msra.mxu1 %v1030_v47  ;;  %v980_v5 = vmax.f32 %v853_v31, 0.0  ;;  %v982_v9 = vmax.f32 %v926_v18, 0.0 }
 0x20a   :  { %v859_v3 = vadd.f32 %v858_v1, %v2235_v54  ;;  %v932_v8 = vadd.f32 %v931_v4, %v2235_v54  ;;  %v981_v10 = vmax.f32 %v855_v56, 0.0  ;;  %v983_v19 = vmax.f32 %v928_v61, 0.0 }
 0x20b   :  { %v988_v7 = vmax.f32 %v857_v62, 0.0  ;;  %v990_v13 = vmax.f32 %v930_v2, 0.0 }
 0x20c   :  { %v989_v42 = vmax.f32 %v859_v3, 0.0  ;;  %1804 = vmatmul.mubr.msk.bf16.gmra.mrb[72].mxu0 %vm639_vm3, %v2301_v59  ;;  %v991_v44 = vmax.f32 %v932_v8, 0.0  ;;  %1808 = vmatmul.mubr.msk.bf16.gmra.mrb[72].mxu1 %vm639_vm3, %v2301_v59 }
 0x20d   :  { %v1036_v53 = vpack.c.bf16 %v988_v7, %v980_v5  ;;  %1190 = vmatprep.mubr.bf16.mxu0 %v1873_v6  ;;  %v1038_v17 = vpack.c.bf16 %v990_v13, %v982_v9  ;;  %1263 = vmatprep.mubr.bf16.mxu1 %v1873_v6 }
 0x20e   :  { %v1037_v20 = vpack.c.bf16 %v989_v42, %v981_v10  ;;  %v862_v21 = vpop.f32.mrb[60].mxu0  ;;  %v1039_v54 = vpack.c.bf16 %v991_v44, %v983_v19  ;;  %v935_v0 = vpop.f32.mrb[60].mxu1 }
 0x20f   :  { %v863_v22 = vadd.f32 %v862_v21, %v2245_v11  ;;  %v864_v48 = vpop.f32.mrb[61].mxu0  ;;  %v936_v23 = vadd.f32 %v935_v0, %v2245_v11  ;;  %v937_v24 = vpop.f32.mrb[61].mxu1 }
 0x210   :  { %v865_v55 = vadd.f32 %v864_v48, %v2245_v11  ;;  %v866_v25 = vpop.f32.mrb[62].mxu0  ;;  %1278 = vmatprep.subr.bf16.mxu0 %v1037_v20  ;;  %v938_v27 = vadd.f32 %v937_v24, %v2245_v11  ;;  %v939_v30 = vpop.f32.mrb[62].mxu1  ;;  %1351 = vmatprep.subr.bf16.mxu1 %v1039_v54 }
 0x211   :  { %v867_v29 = vadd.f32 %v866_v25, %v2247_v16  ;;  %v868_v32 = vpop.f32.mrb[63].mxu0  ;;  %1279 = vmatpush1.bf16.msra.mxu0 %v1036_v53  ;;  %v940_v33 = vadd.f32 %v939_v30, %v2247_v16  ;;  %v941_v35 = vpop.f32.mrb[63].mxu1  ;;  %1352 = vmatpush1.bf16.msra.mxu1 %v1038_v17  ;;  %v996_v36 = vmax.f32 %v863_v22, 0.0  ;;  %v998_v39 = vmax.f32 %v936_v23, 0.0 }
 0x212   :  { %v869_v34 = vadd.f32 %v868_v32, %v2247_v16  ;;  %v942_v38 = vadd.f32 %v941_v35, %v2247_v16  ;;  %v997_v40 = vmax.f32 %v865_v55, 0.0  ;;  %v999_v43 = vmax.f32 %v938_v27, 0.0  ;;  %v2351_v16 = vpop.permute.xlu0 %1058 }
 0x213   :  { %v1004_v37 = vmax.f32 %v867_v29, 0.0  ;;  %v1006_v41 = vmax.f32 %v940_v33, 0.0 }
 0x214   :  { %v1005_v11 = vmax.f32 %v869_v34, 0.0  ;;  %1805 = vmatmul.mubr.msk.bf16.gmra.mrb[76].mxu0 %vm639_vm3, %v1847_v26  ;;  %v1007_v14 = vmax.f32 %v942_v38, 0.0  ;;  %1809 = vmatmul.mubr.msk.bf16.gmra.mrb[76].mxu1 %vm639_vm3, %v1847_v26 }
 0x215   :  { %v1044_v12 = vpack.c.bf16 %v1004_v37, %v996_v36  ;;  %1306 = vmatprep.mubr.bf16.mxu0 %v1873_v6  ;;  %v1046_v45 = vpack.c.bf16 %v1006_v41, %v998_v39  ;;  %1379 = vmatprep.mubr.bf16.mxu1 %v1873_v6 }
 0x216   :  { %v1045_v46 = vpack.c.bf16 %v1005_v11, %v997_v40  ;;  %v1047_v47 = vpack.c.bf16 %v1007_v14, %v999_v43  ;;  %v2363_v9 = vpop.permute.xlu0 %1068 }
 0x218   :  { %1280 = vmatprep.subr.bf16.mxu0 %v1045_v46  ;;  %1353 = vmatprep.subr.bf16.mxu1 %v1047_v47 }
 0x219   :  { %1281 = vmatpush1.bf16.msra.mxu0 %v1044_v12  ;;  %1354 = vmatpush1.bf16.msra.mxu1 %v1046_v45 }
 0x21a   :  { %v2375_v40 = vpop.permute.xlu0 %1078 }
 0x21c   :  { %1810 = vmatmul.mubr.msk.bf16.vlgmr.msra.gmra.mrb[80].mxu0 %vm639_vm3, %v2263_v60  ;;  %1814 = vmatmul.mubr.msk.bf16.vlgmr.msra.gmra.mrb[80].mxu1 %vm639_vm3, %v2263_v60  ;;  %v2353_v60 = vpop.permute.xlu1 %1063 }
 0x21d   :  { %1316 = vmatprep.mubr.bf16.mxu0 %v1873_v6  ;;  %1389 = vmatprep.mubr.bf16.mxu1 %v1873_v6 }
 0x220   :  { %v2365_v19 = vpop.permute.xlu1 %1073 }
 0x224   :  { %1811 = vmatmul.mubr.msk.bf16.gmra.mrb[84].mxu0 %vm639_vm3, %v2282_v28  ;;  %1815 = vmatmul.mubr.msk.bf16.gmra.mrb[84].mxu1 %vm639_vm3, %v2282_v28  ;;  %v2377_v12 = vpop.permute.xlu1 %1083 }
 0x225   :  { %1326 = vmatprep.mubr.bf16.mxu0 %v1873_v6  ;;  %1399 = vmatprep.mubr.bf16.mxu1 %v1873_v6 }
 0x22c   :  { %1812 = vmatmul.mubr.msk.bf16.gmra.mrb[88].mxu0 %vm639_vm3, %v2301_v59  ;;  %1816 = vmatmul.mubr.msk.bf16.gmra.mrb[88].mxu1 %vm639_vm3, %v2301_v59 }
 0x22d   :  { %1336 = vmatprep.mubr.bf16.mxu0 %v1873_v6  ;;  %1409 = vmatprep.mubr.bf16.mxu1 %v1873_v6 }
 0x234   :  { %1813 = vmatmul.mubr.msk.bf16.gmra.mrb[92].mxu0 %vm639_vm3, %v1847_v26  ;;  %1817 = vmatmul.mubr.msk.bf16.gmra.mrb[92].mxu1 %vm639_vm3, %v1847_v26 }
 0x235   :  { %1558 = vmatprep.mubr.bf16.mxu0 %v1873_v6  ;;  %1599 = vmatprep.mubr.bf16.mxu1 %v1873_v6 }
 0x2cf   :  { %v1162_v28 = vpop.f32.mrb[64].mxu0  ;;  %v1235_v50 = vpop.f32.mrb[64].mxu1 }
 0x2d0   :  { %v1163_v49 = vadd.f32 %v1162_v28, %v2351_v16  ;;  %v1164_v15 = vpop.f32.mrb[65].mxu0  ;;  %v1236_v31 = vadd.f32 %v1235_v50, %v2351_v16  ;;  %v1237_v52 = vpop.f32.mrb[65].mxu1 }
 0x2d1   :  { %v1165_v51 = vadd.f32 %v1164_v15, %v2351_v16  ;;  %v1166_v18 = vpop.f32.mrb[66].mxu0  ;;  %v1238_v56 = vadd.f32 %v1237_v52, %v2351_v16  ;;  %v1239_v58 = vpop.f32.mrb[66].mxu1 }
 0x2d2   :  { %v1167_v57 = vadd.f32 %v1166_v18, %v2353_v60  ;;  %v1168_v59 = vpop.f32.mrb[67].mxu0  ;;  %v1240_v61 = vadd.f32 %v1239_v58, %v2353_v60  ;;  %v1241_v63 = vpop.f32.mrb[67].mxu1  ;;  %v1420_v1 = vmax.f32 %v1163_v49, 0.0  ;;  %v1422_v4 = vmax.f32 %v1236_v31, 0.0 }
 0x2d3   :  { %v1169_v62 = vadd.f32 %v1168_v59, %v2353_v60  ;;  %v1242_v3 = vadd.f32 %v1241_v63, %v2353_v60  ;;  %v1421_v5 = vmax.f32 %v1165_v51, 0.0  ;;  %v1423_v10 = vmax.f32 %v1238_v56, 0.0 }
 0x2d4   :  { %v1428_v2 = vmax.f32 %v1167_v57, 0.0  ;;  %v1430_v7 = vmax.f32 %v1240_v61, 0.0 }
 0x2d5   :  { %v1429_v8 = vmax.f32 %v1169_v62, 0.0  ;;  %v1431_v42 = vmax.f32 %v1242_v3, 0.0 }
 0x2d6   :  { %v1485_v13 = vpack.c.bf16 %v1428_v2, %v1420_v1  ;;  %v1487_v53 = vpack.c.bf16 %v1430_v7, %v1422_v4 }
 0x2d7   :  { %v1486_v44 = vpack.c.bf16 %v1429_v8, %v1421_v5  ;;  %v1172_v17 = vpop.f32.mrb[68].mxu0  ;;  %v1488_v20 = vpack.c.bf16 %v1431_v42, %v1423_v10  ;;  %v1245_v54 = vpop.f32.mrb[68].mxu1 }
 0x2d8   :  { %v1173_v21 = vadd.f32 %v1172_v17, %v2363_v9  ;;  %v1174_v22 = vpop.f32.mrb[69].mxu0  ;;  %v1246_v0 = vadd.f32 %v1245_v54, %v2363_v9  ;;  %v1247_v23 = vpop.f32.mrb[69].mxu1 }
 0x2d9   :  { %v1175_v48 = vadd.f32 %v1174_v22, %v2363_v9  ;;  %v1176_v55 = vpop.f32.mrb[70].mxu0  ;;  %1526 = vmatprep.subr.bf16.mxu0 %v1486_v44  ;;  %v1248_v24 = vadd.f32 %v1247_v23, %v2363_v9  ;;  %v1249_v26 = vpop.f32.mrb[70].mxu1  ;;  %1567 = vmatprep.subr.bf16.mxu1 %v1488_v20 }
 0x2da   :  { %v1177_v25 = vadd.f32 %v1176_v55, %v2365_v19  ;;  %v1178_v27 = vpop.f32.mrb[71].mxu0  ;;  %1527 = vmatpush1.bf16.msra.mxu0 %v1485_v13  ;;  %v1250_v29 = vadd.f32 %v1249_v26, %v2365_v19  ;;  %v1251_v32 = vpop.f32.mrb[71].mxu1  ;;  %1568 = vmatpush1.bf16.msra.mxu1 %v1487_v53  ;;  %v1436_v33 = vmax.f32 %v1173_v21, 0.0  ;;  %v1438_v36 = vmax.f32 %v1246_v0, 0.0 }
 0x2db   :  { %v1179_v30 = vadd.f32 %v1178_v27, %v2365_v19  ;;  %v1252_v35 = vadd.f32 %v1251_v32, %v2365_v19  ;;  %v1437_v37 = vmax.f32 %v1175_v48, 0.0  ;;  %v1439_v41 = vmax.f32 %v1248_v24, 0.0  ;;  %v2387_v8 = vpop.permute.xlu0 %1088  ;;  %v2389_v53 = vpop.permute.xlu1 %1093 }
 0x2dc   :  { %v1444_v34 = vmax.f32 %v1177_v25, 0.0  ;;  %v1446_v38 = vmax.f32 %v1250_v29, 0.0 }
 0x2dd   :  { %v1445_v39 = vmax.f32 %v1179_v30, 0.0  ;;  %v1447_v43 = vmax.f32 %v1252_v35, 0.0 }
 0x2de   :  { %v1493_v11 = vpack.c.bf16 %v1444_v34, %v1436_v33  ;;  %v1495_v14 = vpack.c.bf16 %v1446_v38, %v1438_v36 }
 0x2df   :  { %v1494_v45 = vpack.c.bf16 %v1445_v39, %v1437_v37  ;;  %v1182_v46 = vpop.f32.mrb[72].mxu0  ;;  %v1496_v47 = vpack.c.bf16 %v1447_v43, %v1439_v41  ;;  %v1255_v49 = vpop.f32.mrb[72].mxu1 }
 0x2e0   :  { %v1183_v28 = vadd.f32 %v1182_v46, %v2375_v40  ;;  %v1184_v50 = vpop.f32.mrb[73].mxu0  ;;  %v1256_v15 = vadd.f32 %v1255_v49, %v2375_v40  ;;  %v1257_v51 = vpop.f32.mrb[73].mxu1 }
 0x2e1   :  { %v1185_v31 = vadd.f32 %v1184_v50, %v2375_v40  ;;  %v1186_v52 = vpop.f32.mrb[74].mxu0  ;;  %1528 = vmatprep.subr.bf16.mxu0 %v1494_v45  ;;  %v1258_v18 = vadd.f32 %v1257_v51, %v2375_v40  ;;  %v1259_v57 = vpop.f32.mrb[74].mxu1  ;;  %1569 = vmatprep.subr.bf16.mxu1 %v1496_v47 }
 0x2e2   :  { %v1187_v56 = vadd.f32 %v1186_v52, %v2377_v12  ;;  %v1188_v58 = vpop.f32.mrb[75].mxu0  ;;  %1529 = vmatpush1.bf16.msra.mxu0 %v1493_v11  ;;  %v1260_v59 = vadd.f32 %v1259_v57, %v2377_v12  ;;  %v1261_v62 = vpop.f32.mrb[75].mxu1  ;;  %1570 = vmatpush1.bf16.msra.mxu1 %v1495_v14  ;;  %v1452_v63 = vmax.f32 %v1183_v28, 0.0  ;;  %v1454_v3 = vmax.f32 %v1256_v15, 0.0 }
 0x2e3   :  { %v1189_v61 = vadd.f32 %v1188_v58, %v2377_v12  ;;  %v1262_v2 = vadd.f32 %v1261_v62, %v2377_v12  ;;  %v1453_v4 = vmax.f32 %v1185_v31, 0.0  ;;  %v1455_v10 = vmax.f32 %v1258_v18, 0.0 }
 0x2e4   :  { %v1460_v1 = vmax.f32 %v1187_v56, 0.0  ;;  %v1462_v5 = vmax.f32 %v1260_v59, 0.0 }
 0x2e5   :  { %v1461_v7 = vmax.f32 %v1189_v61, 0.0  ;;  %v1463_v42 = vmax.f32 %v1262_v2, 0.0  ;;  %v2407_v61 = vld [vmem:[%s2465_s7] sm:$0x1]  ;;  %s1875_s7 = smov [#allocation2]  }
 0x2e6   :  { %v1501_v13 = vpack.c.bf16 %v1460_v1, %v1452_v63  ;;  %v1503_v44 = vpack.c.bf16 %v1462_v5, %v1454_v3  ;;  %s1742_s17 = sshll.u32 %s1875_s7, 4  ;;  %s1743_s17 = int_to_ptr.vmem [resolvable:$true] %s1742_s17 }
 0x2e7   :  { %v1502_v17 = vpack.c.bf16 %v1461_v7, %v1453_v4  ;;  %v1192_v20 = vpop.f32.mrb[76].mxu0  ;;  %v1504_v21 = vpack.c.bf16 %v1463_v42, %v1455_v10  ;;  %v1265_v22 = vpop.f32.mrb[76].mxu1  ;;  %s1848_s18 = scalar_lea.vmem %s1743_s17, 256  ;;  %p1853_p1 = scmp.lt.s32.totalorder %s1743_s17, %s1743_s17 }
 0x2e8   :  { %v1193_v54 = vadd.f32 %v1192_v20, %v2387_v8  ;;  %v1194_v0 = vpop.f32.mrb[77].mxu0  ;;  %v1266_v48 = vadd.f32 %v1265_v22, %v2387_v8  ;;  %v1267_v55 = vpop.f32.mrb[77].mxu1  ;;  %p1849_p0 = scmp.ne.s32.totalorder %s1743_s17, %s1848_s18  ;;  %p1854_p2 = scmp.lt.s32.totalorder %s1848_s18, %s1848_s18 }
 0x2e9   :  { %v1195_v23 = vadd.f32 %v1194_v0, %v2387_v8  ;;  %v1196_v24 = vpop.f32.mrb[78].mxu0  ;;  %1530 = vmatprep.subr.bf16.mxu0 %v1502_v17  ;;  %v1268_v25 = vadd.f32 %v1267_v55, %v2387_v8  ;;  %v1269_v27 = vpop.f32.mrb[78].mxu1  ;;  %1571 = vmatprep.subr.bf16.mxu1 %v1504_v21 }
 0x2ea   :  { %v1197_v26 = vadd.f32 %v1196_v24, %v2389_v53  ;;  %v1198_v29 = vpop.f32.mrb[79].mxu0  ;;  %1531 = vmatpush1.bf16.msra.mxu0 %v1501_v13  ;;  %v1270_v30 = vadd.f32 %v1269_v27, %v2389_v53  ;;  %v1271_v33 = vpop.f32.mrb[79].mxu1  ;;  %1572 = vmatpush1.bf16.msra.mxu1 %v1503_v44  ;;  %v1468_v34 = vmax.f32 %v1193_v54, 0.0  ;;  %v1470_v37 = vmax.f32 %v1266_v48, 0.0  ;;  %p1855_p3 = por %p1854_p2, %p1853_p1 }
 0x2eb   :  { %v1199_v32 = vadd.f32 %v1198_v29, %v2389_v53  ;;  %v1272_v36 = vadd.f32 %v1271_v33, %v2389_v53  ;;  %v1469_v38 = vmax.f32 %v1195_v23, 0.0  ;;  %v1471_v11 = vmax.f32 %v1268_v25, 0.0 }
 0x2ec   :  { %v1476_v35 = vmax.f32 %v1197_v26, 0.0  ;;  %v1478_v39 = vmax.f32 %v1270_v30, 0.0  ;;  %p1856_p4 = pnand %p1855_p3, %p1849_p0 }
 0x2ed   :  { %v1477_v41 = vmax.f32 %v1199_v32, 0.0  ;;  %v1479_v14 = vmax.f32 %v1272_v36, 0.0 }
 0x2ee   :  { %v1509_v43 = vpack.c.bf16 %v1476_v35, %v1468_v34  ;;  %v1511_v45 = vpack.c.bf16 %v1478_v39, %v1470_v37 }
 0x2ef   :  { %v1510_v46 = vpack.c.bf16 %v1477_v41, %v1469_v38  ;;  %v1308_v47 = vpop.f32.mrb[80].mxu0  ;;  %v1512_v28 = vpack.c.bf16 %v1479_v14, %v1471_v11  ;;  %v1381_v50 = vpop.f32.mrb[80].mxu1 }
 0x2f0   :  { %v1309_v49 = vadd.f32 %v1308_v47, %v2351_v16  ;;  %v1310_v15 = vpop.f32.mrb[81].mxu0  ;;  %v1382_v31 = vadd.f32 %v1381_v50, %v2351_v16  ;;  %v1383_v52 = vpop.f32.mrb[81].mxu1 }
 0x2f1   :  { %v1311_v51 = vadd.f32 %v1310_v15, %v2351_v16  ;;  %v1312_v18 = vpop.f32.mrb[82].mxu0  ;;  %1532 = vmatprep.subr.bf16.mxu0 %v1510_v46  ;;  %v1384_v56 = vadd.f32 %v1383_v52, %v2351_v16  ;;  %v1385_v58 = vpop.f32.mrb[82].mxu1  ;;  %1573 = vmatprep.subr.bf16.mxu1 %v1512_v28 }
 0x2f2   :  { %v1313_v57 = vadd.f32 %v1312_v18, %v2353_v60  ;;  %v1314_v59 = vpop.f32.mrb[83].mxu0  ;;  %1533 = vmatpush1.bf16.msra.mxu0 %v1509_v43  ;;  %v1386_v62 = vadd.f32 %v1385_v58, %v2353_v60  ;;  %v1387_v1 = vpop.f32.mrb[83].mxu1  ;;  %1574 = vmatpush1.bf16.msra.mxu1 %v1511_v45  ;;  %v1424_v2 = vmax.f32 %v1309_v49, 0.0  ;;  %v1426_v4 = vmax.f32 %v1382_v31, 0.0 }
 0x2f3   :  { %v1315_v63 = vadd.f32 %v1314_v59, %v2353_v60  ;;  %v1388_v16 = vadd.f32 %v1387_v1, %v2353_v60  ;;  %v1425_v5 = vmax.f32 %v1311_v51, 0.0  ;;  %v1427_v13 = vmax.f32 %v1384_v56, 0.0 }
 0x2f4   :  { %v1432_v3 = vmax.f32 %v1313_v57, 0.0  ;;  %v1434_v7 = vmax.f32 %v1386_v62, 0.0 }
 0x2f5   :  { %v1433_v10 = vmax.f32 %v1315_v63, 0.0  ;;  %1818 = vmatmul.mubr.msk.bf16.vlgmr.msra.gmra.mrb[96].mxu0 %vm639_vm3, %v2407_v61  ;;  %v1435_v44 = vmax.f32 %v1388_v16, 0.0  ;;  %1819 = vmatmul.mubr.msk.bf16.vlgmr.msra.gmra.mrb[96].mxu1 %vm639_vm3, %v2407_v61 }
 0x2f6   :  { %v1489_v42 = vpack.c.bf16 %v1432_v3, %v1424_v2  ;;  %1640 = vmatprep.mubr.bf16.mxu0 %v1873_v6  ;;  %v1491_v17 = vpack.c.bf16 %v1434_v7, %v1426_v4  ;;  %1681 = vmatprep.mubr.bf16.mxu1 %v1873_v6 }
 0x2f7   :  { %v1490_v20 = vpack.c.bf16 %v1433_v10, %v1425_v5  ;;  %v1318_v21 = vpop.f32.mrb[84].mxu0  ;;  %v1492_v60 = vpack.c.bf16 %v1435_v44, %v1427_v13  ;;  %v1391_v22 = vpop.f32.mrb[84].mxu1 }
 0x2f8   :  { %v1319_v54 = vadd.f32 %v1318_v21, %v2363_v9  ;;  %v1320_v0 = vpop.f32.mrb[85].mxu0  ;;  %v1392_v48 = vadd.f32 %v1391_v22, %v2363_v9  ;;  %v1393_v55 = vpop.f32.mrb[85].mxu1 }
 0x2f9   :  { %v1321_v23 = vadd.f32 %v1320_v0, %v2363_v9  ;;  %v1322_v24 = vpop.f32.mrb[86].mxu0  ;;  %1608 = vmatprep.subr.bf16.mxu0 %v1490_v20  ;;  %v1394_v25 = vadd.f32 %v1393_v55, %v2363_v9  ;;  %v1395_v27 = vpop.f32.mrb[86].mxu1  ;;  %1649 = vmatprep.subr.bf16.mxu1 %v1492_v60 }
 0x2fa   :  { %v1323_v26 = vadd.f32 %v1322_v24, %v2365_v19  ;;  %v1324_v29 = vpop.f32.mrb[87].mxu0  ;;  %1609 = vmatpush1.bf16.msra.mxu0 %v1489_v42  ;;  %v1396_v6 = vadd.f32 %v1395_v27, %v2365_v19  ;;  %v1397_v32 = vpop.f32.mrb[87].mxu1  ;;  %1650 = vmatpush1.bf16.msra.mxu1 %v1491_v17  ;;  %v1440_v33 = vmax.f32 %v1319_v54, 0.0  ;;  %v1442_v36 = vmax.f32 %v1392_v48, 0.0 }
 0x2fb   :  { %v1325_v30 = vadd.f32 %v1324_v29, %v2365_v19  ;;  %v1398_v35 = vadd.f32 %v1397_v32, %v2365_v19  ;;  %v1441_v37 = vmax.f32 %v1321_v23, 0.0  ;;  %v1443_v39 = vmax.f32 %v1394_v25, 0.0 }
 0x2fc   :  { %v1448_v34 = vmax.f32 %v1323_v26, 0.0  ;;  %v1450_v38 = vmax.f32 %v1396_v6, 0.0 }
 0x2fd   :  { %v1449_v9 = vmax.f32 %v1325_v30, 0.0  ;;  %v1451_v11 = vmax.f32 %v1398_v35, 0.0 }
 0x2fe   :  { %v1497_v41 = vpack.c.bf16 %v1448_v34, %v1440_v33  ;;  %v1499_v43 = vpack.c.bf16 %v1450_v38, %v1442_v36 }
 0x2ff   :  { %v1498_v14 = vpack.c.bf16 %v1449_v9, %v1441_v37  ;;  %v1328_v45 = vpop.f32.mrb[88].mxu0  ;;  %v1500_v46 = vpack.c.bf16 %v1451_v11, %v1443_v39  ;;  %v1401_v28 = vpop.f32.mrb[88].mxu1 }
 0x300   :  { %v1329_v47 = vadd.f32 %v1328_v45, %v2375_v40  ;;  %v1330_v49 = vpop.f32.mrb[89].mxu0  ;;  %v1402_v50 = vadd.f32 %v1401_v28, %v2375_v40  ;;  %v1403_v19 = vpop.f32.mrb[89].mxu1 }
 0x301   :  { %v1331_v15 = vadd.f32 %v1330_v49, %v2375_v40  ;;  %v1332_v31 = vpop.f32.mrb[90].mxu0  ;;  %1610 = vmatprep.subr.bf16.mxu0 %v1498_v14  ;;  %v1404_v51 = vadd.f32 %v1403_v19, %v2375_v40  ;;  %v1405_v18 = vpop.f32.mrb[90].mxu1  ;;  %1651 = vmatprep.subr.bf16.mxu1 %v1500_v46 }
 0x302   :  { %v1333_v52 = vadd.f32 %v1332_v31, %v2377_v12  ;;  %v1334_v56 = vpop.f32.mrb[91].mxu0  ;;  %1611 = vmatpush1.bf16.msra.mxu0 %v1497_v41  ;;  %v1406_v57 = vadd.f32 %v1405_v18, %v2377_v12  ;;  %v1407_v59 = vpop.f32.mrb[91].mxu1  ;;  %1652 = vmatpush1.bf16.msra.mxu1 %v1499_v43  ;;  %v1456_v62 = vmax.f32 %v1329_v47, 0.0  ;;  %v1458_v2 = vmax.f32 %v1402_v50, 0.0 }
 0x303   :  { %v1335_v58 = vadd.f32 %v1334_v56, %v2377_v12  ;;  %v1408_v1 = vadd.f32 %v1407_v59, %v2377_v12  ;;  %v1457_v3 = vmax.f32 %v1331_v15, 0.0  ;;  %v1459_v4 = vmax.f32 %v1404_v51, 0.0  ;;  %v1521_v14 = vpop.permute.xlu0 %1520 }
 0x304   :  { %v1464_v63 = vmax.f32 %v1333_v52, 0.0  ;;  %v1466_v16 = vmax.f32 %v1406_v57, 0.0  ;;  %v1703_v41 = vlaneseq }
 0x305   :  { %v1465_v40 = vmax.f32 %v1335_v58, 0.0  ;;  %v1467_v7 = vmax.f32 %v1408_v1, 0.0 }
 0x306   :  { %v1505_v5 = vpack.c.bf16 %v1464_v63, %v1456_v62  ;;  %v1507_v10 = vpack.c.bf16 %v1466_v16, %v1458_v2  ;;  %v1704_v43 = vshrl.u32 %v1703_v41, 7 }
 0x307   :  { %v1506_v13 = vpack.c.bf16 %v1465_v40, %v1457_v3  ;;  %v1338_v42 = vpop.f32.mrb[92].mxu0  ;;  %v1508_v44 = vpack.c.bf16 %v1467_v7, %v1459_v4  ;;  %v1411_v20 = vpop.f32.mrb[92].mxu1 }
 0x308   :  { %v1339_v17 = vadd.f32 %v1338_v42, %v2387_v8  ;;  %v1340_v21 = vpop.f32.mrb[93].mxu0  ;;  %v1412_v60 = vadd.f32 %v1411_v20, %v2387_v8  ;;  %v1413_v12 = vpop.f32.mrb[93].mxu1 }
 0x309   :  { %v1341_v54 = vadd.f32 %v1340_v21, %v2387_v8  ;;  %v1342_v22 = vpop.f32.mrb[94].mxu0  ;;  %1612 = vmatprep.subr.bf16.mxu0 %v1506_v13  ;;  %v1414_v0 = vadd.f32 %v1413_v12, %v2387_v8  ;;  %v1415_v23 = vpop.f32.mrb[94].mxu1  ;;  %1653 = vmatprep.subr.bf16.mxu1 %v1508_v44 }
 0x30a   :  { %v1343_v48 = vadd.f32 %v1342_v22, %v2389_v53  ;;  %v1344_v55 = vpop.f32.mrb[95].mxu0  ;;  %1613 = vmatpush1.bf16.msra.mxu0 %v1505_v5  ;;  %v1416_v24 = vadd.f32 %v1415_v23, %v2389_v53  ;;  %v1417_v26 = vpop.f32.mrb[95].mxu1  ;;  %1654 = vmatpush1.bf16.msra.mxu1 %v1507_v10  ;;  %v1472_v27 = vmax.f32 %v1339_v17, 0.0  ;;  %v1474_v30 = vmax.f32 %v1412_v60, 0.0 }
 0x30b   :  { %v1345_v25 = vadd.f32 %v1344_v55, %v2389_v53  ;;  %v1418_v6 = vadd.f32 %v1417_v26, %v2389_v53  ;;  %v1473_v32 = vmax.f32 %v1341_v54, 0.0  ;;  %v1475_v34 = vmax.f32 %v1414_v0, 0.0 }
 0x30c   :  { %v1480_v29 = vmax.f32 %v1343_v48, 0.0  ;;  %v1482_v33 = vmax.f32 %v1416_v24, 0.0  ;;  %v1874_v53 = vmov 1983009808  }
 0x30d   :  { %v1481_v8 = vmax.f32 %v1345_v25, 0.0  ;;  %v1483_v36 = vmax.f32 %v1418_v6, 0.0  ;;  %v1701_v39 = vunpack.c.l.s4 %v1874_v53 }
 0x30e   :  { %v1513_v35 = vpack.c.bf16 %v1480_v29, %v1472_v27  ;;  %v1515_v37 = vpack.c.bf16 %v1482_v33, %v1474_v30 }
 0x30f   :  { %v1514_v38 = vpack.c.bf16 %v1481_v8, %v1473_v32  ;;  %v1516_v9 = vpack.c.bf16 %v1483_v36, %v1475_v34  ;;  %v1702_v11 = vunpack.c.0.s8 %v1701_v39 }
 0x311   :  { %1614 = vmatprep.subr.bf16.mxu0 %v1514_v38  ;;  %1655 = vmatprep.subr.bf16.mxu1 %v1516_v9  ;;  %v1705_v15 = vsub.s32 %v1702_v11, %v1704_v43 }
 0x312   :  { %1615 = vmatpush1.bf16.msra.mxu0 %v1513_v35  ;;  %1656 = vmatpush1.bf16.msra.mxu1 %v1515_v37 }
 0x315   :  { %1820 = vmatmul.mubr.msk.bf16.vlgmr.msra.gmra.mrb[100].mxu0 %vm639_vm3, %v2407_v61  ;;  %1821 = vmatmul.mubr.msk.bf16.vlgmr.msra.gmra.mrb[100].mxu1 %vm639_vm3, %v2407_v61 }
 0x3c8   :  { %v1560_v45 = vpop.f32.mrb[96].mxu0  ;;  %v1601_v47 = vpop.f32.mrb[96].mxu1 }
 0x3c9   :  { %v1561_v46 = vadd.f32 %v1560_v45, %v1521_v14  ;;  %v1562_v28 = vpop.f32.mrb[97].mxu0  ;;  %v1602_v49 = vadd.f32 %v1601_v47, %v1521_v14  ;;  %v1603_v19 = vpop.f32.mrb[97].mxu1 }
 0x3ca   :  { %v1563_v50 = vadd.f32 %v1562_v28, %v1521_v14  ;;  %v1564_v31 = vpop.f32.mrb[98].mxu0  ;;  %v1604_v51 = vadd.f32 %v1603_v19, %v1521_v14  ;;  %v1605_v52 = vpop.f32.mrb[98].mxu1 }
 0x3cb   :  { %v1565_v18 = vpop.f32.mrb[99].mxu0  ;;  %v1606_v61 = vpop.f32.mrb[99].mxu1 }
 0x3cc   :  { %v1698_v56 = vcombine.low %v1561_v46, %v1563_v50  ;;  %v1699_v57 = vcombine.low %v1602_v49, %v1604_v51 }
 0x3ce   :  { %v1706_v58 = vrot.slane %v1698_v56, %v1705_v15  ;;  %v1713_v59 = vrot.slane %v1699_v57, %v1705_v15 }
 0x3d0   :  { %v1714_v62 = vcombine.low %v1706_v58, %v1713_v59 }
 0x3d2   :  { %1734 = vst [vmem:[#allocation2] sm:$0xff] %v1714_v62 }
 0x3e8   :  { %v1642_v63 = vpop.f32.mrb[100].mxu0  ;;  %v1683_v2 = vpop.f32.mrb[100].mxu1 }
 0x3e9   :  { %v1643_v1 = vadd.f32 %v1642_v63, %v1521_v14  ;;  %v1644_v3 = vpop.f32.mrb[101].mxu0  ;;  %v1684_v16 = vadd.f32 %v1683_v2, %v1521_v14  ;;  %v1685_v4 = vpop.f32.mrb[101].mxu1 }
 0x3ea   :  { %v1645_v40 = vadd.f32 %v1644_v3, %v1521_v14  ;;  %v1646_v5 = vpop.f32.mrb[102].mxu0  ;;  %v1686_v7 = vadd.f32 %v1685_v4, %v1521_v14  ;;  %v1687_v10 = vpop.f32.mrb[102].mxu1 }
 0x3eb   :  { %v1647_v13 = vpop.f32.mrb[103].mxu0  ;;  %v1688_v44 = vpop.f32.mrb[103].mxu1 }
 0x3ec   :  { %v1715_v42 = vcombine.low %v1643_v1, %v1645_v40  ;;  %v1716_v17 = vcombine.low %v1684_v16, %v1686_v7 }
 0x3ee   :  { %v1723_v20 = vrot.slane %v1715_v42, %v1705_v15  ;;  %v1730_v21 = vrot.slane %v1716_v17, %v1705_v15 }
 0x3f0   :  { %v1731_v60 = vcombine.low %v1723_v20, %v1730_v21 }
 0x3f2   :  { %1735 = vst [vmem:[#allocation2 + $0x8] sm:$0xff] %v1731_v60 }
 0x3f3   :  { %1859 = shalt.err (!%p1856_p4)
}
 0x3f4   :  { %s1860_s20 = scalar_lea.hbm %s2467_s9, 256 }
 0x3f5   :  { %p1861_p5 = scmp.ne.s32.totalorder %s2467_s9, %s1860_s20  ;;  %p1864_p6 = scmp.lt.u32.totalorder %s1860_s20, %s2467_s9 }
 0x3f7   :  { %p1866_p7 = pnand %p1864_p6, %p1861_p5 }
 0x3f9   :  { %1869 = shalt.err (!%p1866_p7)
}
 0x3fa   :  { %1745 = dma.vmem_to_hbm [thread:$0]  %s1743_s17, 256, %s2467_s9, [#allocation3]  }
 0x3fb   :  { %1870 = dma.done.wait [#allocation3], 256  }
 0x3fc   :  { %1871 = vsyncadd [#allocation3], 4294967040 }
 0x3fd   :  { %1749 = vsyncpa [#allocation3], 1 }

</bundles_post_ra>
